<compile_context>
chip_gen: v7x
topology: tpu7x:2x2x1
jax: 0.10.0
libtpu: 0.0.40
codegen_flags: <defaults>
</compile_context>

<pallas_src>
import functools

import jax
import jax.numpy as jnp
from jax import lax
from jax.experimental import pallas as pl
from jax.experimental.pallas import tpu as pltpu


# ----------------------------- Pallas kernel ------------------------------- #

def lstm_recurrence_kernel(len_ref, emb_ref, gxb_ref,
                           wih_ref, bih_ref, whh_ref,
                           w1f_ref, w1b_ref, b1_ref, w2_ref, b2_ref,
                           out_ref, h_scr, c_scr, g_scr, *, time_chunk, unroll):
    # len_ref: (BB, 1) i32            emb_ref: (Tt, BB, E)   compute-dtype embedding stream
    # gxb_ref: (BB, 4Hp) f32          (backward-direction input gates of last valid token)
    # wih_ref: (E, 4Hp)  bih_ref: (1, 4Hp) f32  whh_ref: (Hp, 4Hp)
    # w1f/w1b: (Hp, Hp)  b1: (1, Hp)  w2: (Hp, Cp)  b2: (1, Cp)
    # out_ref: (BB, Cp) f32           h_scr/c_scr: (BB, Hp) f32 state across time chunks
    # g_scr:   (Tt, BB, 4Hp) f32      per-chunk precomputed input-gate scratch
    Tt = time_chunk
    BB, Hp = h_scr.shape
    cd = whh_ref.dtype                                    # matmul-input (compute) dtype

    t_chunk = pl.program_id(1)

    @pl.when(t_chunk == 0)
    def _():
        h_scr[...] = jnp.zeros_like(h_scr)
        c_scr[...] = jnp.zeros_like(c_scr)

    # Hoisted weight loads / broadcasts (kept out of the loops).
    wih = wih_ref[...]
    whh = whh_ref[...]
    bih = jnp.broadcast_to(bih_ref[...], (BB, 4 * Hp))
    lens_bh = jnp.broadcast_to(len_ref[...], (BB, Hp))
    t_base = t_chunk * Tt

    # (1) Input projection for the whole chunk.  These Tt matmuls are mutually
    #     independent (no recurrent dependency), so they pipeline on the MXU and stay
    #     off the serial critical path.  f32 accumulation, stored as f32.
    def proj_body(tl, dummy):
        g_scr[tl] = jnp.dot(emb_ref[tl], wih, preferred_element_type=jnp.float32) + bih
        return dummy
    lax.fori_loop(0, Tt, proj_body, 0, unroll=unroll)

    # (2) Serial recurrence: only h @ W_hh is on the dependent chain.
    def body(tl, carry):
        h, c = carry
        gates = g_scr[tl] + jnp.dot(h.astype(cd), whh,
                                    preferred_element_type=jnp.float32)
        # Hp is a multiple of 128 -> all gate slices are lane-aligned (no relayouts).
        i = jax.nn.sigmoid(gates[:, 0 * Hp:1 * Hp])
        f = jax.nn.sigmoid(gates[:, 1 * Hp:2 * Hp])
        g = jnp.tanh(gates[:, 2 * Hp:3 * Hp])
        o = jax.nn.sigmoid(gates[:, 3 * Hp:4 * Hp])
        c_new = f * c + i * g
        h_new = o * jnp.tanh(c_new)
        valid = lens_bh > (t_base + tl)                   # freeze state past valid length
        return jnp.where(valid, h_new, h), jnp.where(valid, c_new, c)

    h, c = lax.fori_loop(0, Tt, body, (h_scr[...], c_scr[...]), unroll=unroll)
    h_scr[...] = h
    c_scr[...] = c

    # Final time chunk: backward-direction cell (zero init state) + classifier head.
    @pl.when(t_chunk == pl.num_programs(1) - 1)
    def _():
        gb = gxb_ref[...]                                  # (BB, 4Hp) f32
        ib = jax.nn.sigmoid(gb[:, 0 * Hp:1 * Hp])
        gg = jnp.tanh(gb[:, 2 * Hp:3 * Hp])
        ob = jax.nn.sigmoid(gb[:, 3 * Hp:4 * Hp])
        hb = ob * jnp.tanh(ib * gg)                        # c0 = 0 -> forget gate irrelevant
        # Split-w1 head (no lane-axis concat); output padded to lane width 128.
        z = (jnp.dot(h.astype(cd), w1f_ref[...], preferred_element_type=jnp.float32)
             + jnp.dot(hb.astype(cd), w1b_ref[...], preferred_element_type=jnp.float32)
             + b1_ref[...])
        z = jnp.maximum(z, 0.0)
        out_ref[...] = (jnp.dot(z.astype(cd), w2_ref[...],
                                preferred_element_type=jnp.float32)
                        + b2_ref[...]).astype(out_ref.dtype)


# ------------------------------- wrapper ----------------------------------- #

def _round_up(x, m):
    return ((x + m - 1) // m) * m


def _pad_gate_cols(w, H, Hp):
    """(..., 4H) -> (..., 4Hp): zero-pad each of the i/f/g/o blocks to Hp columns."""
    lead = w.shape[:-1]
    w = w.reshape(lead + (4, H))
    w = jnp.pad(w, [(0, 0)] * len(lead) + [(0, 0), (0, Hp - H)])
    return w.reshape(lead + (4 * Hp,))


def lstm_model_forward(x_ids, x_lengths, params, *,
                       compute_dtype=jnp.bfloat16, time_chunk=32, batch_block=256):
    """x_ids: (B, T) int32 token ids, x_lengths: (B,) int32 valid lengths (>= 1)."""
    emb_table = params["embedding"]
    E = emb_table.shape[1]
    H = params["w_hh_f"].shape[0]
    C = params["w2"].shape[1]
    B, T = x_ids.shape

    # Lane-align hidden / class dims; zero padding keeps padded units exactly zero.
    Hp = _round_up(H, 128)
    Cp = _round_up(C, 128)

    # Batch block: as large as the batch allows (fills the MXU M dimension), but keep
    # >= 2 blocks when the batch is big enough so the "parallel" batch axis can be
    # sharded across v7x's two TensorCores.
    BB = min(batch_block, _round_up(B, 16))
    if BB >= 256 and _round_up(B, BB) < 2 * BB:
        BB = 128
    Bp = _round_up(B, BB)

    Tt = min(time_chunk, T)
    Tp = _round_up(T, Tt)
    unroll = min(8, Tt)                                    # partial unroll of in-kernel loops

    # NOTE: pack_padded_sequence requires all lengths >= 1 (PyTorch constraint).
    lens = x_lengths.astype(jnp.int32)
    ids_p = jnp.pad(x_ids.astype(jnp.int32), ((0, Bp - B), (0, Tp - T)))
    lens_p = jnp.pad(lens, (0, Bp - B), constant_values=1)

    # Embedding gather directly time-major, cast to compute dtype before streaming
    # (halves HBM bytes of the largest streamed tensor in the bf16 path).
    emb_tm = emb_table[ids_p.T].astype(compute_dtype)                      # (Tp, Bp, E)

    # Gate-padded (lane-aligned) weights / biases; gate order i, f, g, o.
    wih_f = _pad_gate_cols(params["w_ih_f"], H, Hp).astype(compute_dtype)  # (E, 4Hp)
    b_f = _pad_gate_cols(params["b_f"], H, Hp).astype(jnp.float32)         # (1, 4Hp)
    whh_f = _pad_gate_cols(jnp.pad(params["w_hh_f"], ((0, Hp - H), (0, 0))),
                           H, Hp).astype(compute_dtype)                    # (Hp, 4Hp)
    wih_b = _pad_gate_cols(params["w_ih_b"], H, Hp).astype(compute_dtype)
    b_b = _pad_gate_cols(params["b_b"], H, Hp).astype(jnp.float32)

    # Backward direction of the packed bi-LSTM at index len-1 == one reverse cell step
    # from zero state on the last valid token -> only its input projection is needed.
    last_tok = emb_tm[lens_p - 1, jnp.arange(Bp)]                          # (Bp, E)
    gxb = (jnp.dot(last_tok.astype(compute_dtype), wih_b,
                   preferred_element_type=jnp.float32) + b_b)              # (Bp, 4Hp) f32

    # Split + padded classifier head (lane-dense output; slice [:C] afterwards).
    w1f = jnp.pad(params["w1"][:H], ((0, Hp - H), (0, Hp - H))).astype(compute_dtype)
    w1b = jnp.pad(params["w1"][H:], ((0, Hp - H), (0, Hp - H))).astype(compute_dtype)
    b1 = jnp.pad(params["b1"], ((0, 0), (0, Hp - H))).astype(jnp.float32)
    w2 = jnp.pad(params["w2"], ((0, Hp - H), (0, Cp - C))).astype(compute_dtype)
    b2 = jnp.pad(params["b2"], ((0, 0), (0, Cp - C))).astype(jnp.float32)
    lens_col = lens_p.reshape(Bp, 1)

    n_bb = Bp // BB
    n_tc = Tp // Tt
    bb_map = lambda b, t: (b, 0)
    const_map = lambda b, t: (0, 0)

    # Chip-aware VMEM budget: big tiles on v5e/v6e (128 MiB physical), tighter on v7x
    # (64 MiB physical).  Capped well below physical to leave compiler headroom.
    try:
        vmem_cap = pltpu.get_tpu_info().vmem_capacity_bytes
    except Exception:
        vmem_cap = 64 * 1024 * 1024
    vmem_limit = int(min(100 * 1024 * 1024, (vmem_cap * 3) // 4))

    kernel = functools.partial(lstm_recurrence_kernel, time_chunk=Tt, unroll=unroll)
    out = pl.pallas_call(
        kernel,
        out_shape=jax.ShapeDtypeStruct((Bp, Cp), jnp.float32),
        grid=(n_bb, n_tc),
        in_specs=[
            pl.BlockSpec((BB, 1), bb_map),                           # lengths
            pl.BlockSpec((Tt, BB, E), lambda b, t: (t, b, 0)),       # embedding stream
            pl.BlockSpec((BB, 4 * Hp), bb_map),                      # backward input gates
            # Constant weights: block index never changes, so they are DMA'd only once.
            pl.BlockSpec((E, 4 * Hp), const_map),                    # W_ih forward
            pl.BlockSpec((1, 4 * Hp), const_map),                    # b forward (f32)
            pl.BlockSpec((Hp, 4 * Hp), const_map),                   # W_hh forward
            pl.BlockSpec((Hp, Hp), const_map),                       # w1_f
            pl.BlockSpec((Hp, Hp), const_map),                       # w1_b
            pl.BlockSpec((1, Hp), const_map),                        # b1
            pl.BlockSpec((Hp, Cp), const_map),                       # w2
            pl.BlockSpec((1, Cp), const_map),                        # b2
        ],
        out_specs=pl.BlockSpec((BB, Cp), bb_map),
        scratch_shapes=[pltpu.VMEM((BB, Hp), jnp.float32),           # h state (f32)
                        pltpu.VMEM((BB, Hp), jnp.float32),           # c state (f32)
                        pltpu.VMEM((Tt, BB, 4 * Hp), jnp.float32)],  # chunk gates (f32)
        compiler_params=pltpu.CompilerParams(
            dimension_semantics=("parallel", "arbitrary"),
            vmem_limit_bytes=vmem_limit),
    )(lens_col, emb_tm, gxb, wih_f, b_f, whh_f, w1f, w1b, b1, w2, b2)

    return out[:B, :C]


# ------------------------- pure-JAX reference ------------------------------ #

def reference_forward(x_ids, x_lengths, params):
    emb = params["embedding"][x_ids].astype(jnp.float32)
    B, T, E = emb.shape
    H = params["w_hh_f"].shape[0]
    lens = x_lengths.astype(jnp.int32)

    def cell(x_t, h, c, wih, whh, b):
        gates = x_t @ wih + h @ whh + b
        i, f, g, o = jnp.split(gates, 4, axis=-1)
        i = jax.nn.sigmoid(i); f = jax.nn.sigmoid(f)
        g = jnp.tanh(g); o = jax.nn.sigmoid(o)
        c_new = f * c + i * g
        return o * jnp.tanh(c_new), c_new

    h = jnp.zeros((B, H), jnp.float32)
    c = jnp.zeros((B, H), jnp.float32)
    for t in range(T):
        h_new, c_new = cell(emb[:, t, :], h, c,
                            params["w_ih_f"], params["w_hh_f"], params["b_f"])
        valid = (lens > t)[:, None]
        h = jnp.where(valid, h_new, h)
        c = jnp.where(valid, c_new, c)
    last_tok = emb[jnp.arange(B), lens - 1, :]
    hb, _ = cell(last_tok, jnp.zeros((B, H)), jnp.zeros((B, H)),
                 params["w_ih_b"], params["w_hh_b"], params["b_b"])
    feat = jnp.concatenate([h, hb], axis=-1)
    z = jnp.maximum(feat @ params["w1"] + params["b1"], 0.0)
    return z @ params["w2"] + params["b2"]


# --------------------------------- main ------------------------------------ #

def init_params(key, n_embeddings, embedding_dim, n_hidden, n_classes):
    ks = jax.random.split(key, 12)
    s = 0.1
    E, H, C = embedding_dim, n_hidden, n_classes
    return {
        "embedding": jax.random.normal(ks[0], (n_embeddings, E), jnp.float32),
        # LSTM weights pre-transposed for x @ W; gate order i, f, g, o.
        "w_ih_f": s * jax.random.normal(ks[1], (E, 4 * H), jnp.float32),
        "w_hh_f": s * jax.random.normal(ks[2], (H, 4 * H), jnp.float32),
        "b_f":    s * jax.random.normal(ks[3], (1, 4 * H), jnp.float32),  # b_ih + b_hh
        "w_ih_b": s * jax.random.normal(ks[4], (E, 4 * H), jnp.float32),
        "w_hh_b": s * jax.random.normal(ks[5], (H, 4 * H), jnp.float32),
        "b_b":    s * jax.random.normal(ks[6], (1, 4 * H), jnp.float32),
        "w1":     s * jax.random.normal(ks[7], (2 * H, H), jnp.float32),
        "b1":     s * jax.random.normal(ks[8], (1, H), jnp.float32),
        "w2":     s * jax.random.normal(ks[9], (H, C), jnp.float32),
        "b2":     s * jax.random.normal(ks[10], (1, C), jnp.float32),
    }


if __name__ == "__main__":
    n_embeddings, embedding_dim, n_hidden, n_classes = 100, 32, 32, 4
    B, T = 2, 8

    key = jax.random.PRNGKey(0)
    kp, kx = jax.random.split(key)
    params = init_params(kp, n_embeddings, embedding_dim, n_hidden, n_classes)

    x_ids = jax.random.randint(kx, (B, T), 0, n_embeddings, dtype=jnp.int32)
    # pack_padded_sequence default requires lengths sorted descending and >= 1.
    x_lengths = jnp.array([8, 5], dtype=jnp.int32)

    ref = reference_forward(x_ids, x_lengths, params)

    # Strict numerical check of the Pallas path in f32 (time_chunk=4 -> 2 grid chunks,
    # exercising the VMEM state carry and the fused per-chunk input projection).
    fwd_f32 = jax.jit(functools.partial(lstm_model_forward,
                                        compute_dtype=jnp.float32, time_chunk=4))
    out_f32 = jax.block_until_ready(fwd_f32(x_ids, x_lengths, params))
    assert out_f32.shape == (B, n_classes)
    assert jnp.allclose(out_f32, ref, atol=1e-4, rtol=1e-4), (out_f32, ref)

    # Fast path: bf16 matmul inputs / bf16 embedding stream with f32 accumulation.
    fwd_bf16 = jax.jit(functools.partial(lstm_model_forward,
                                         compute_dtype=jnp.bfloat16))
    out_bf16 = jax.block_until_ready(fwd_bf16(x_ids, x_lengths, params))
    assert out_bf16.shape == (B, n_classes)
    assert jnp.allclose(out_bf16, ref, atol=3e-2, rtol=3e-2), (out_bf16, ref)

    print("KERNEL_OK")
</pallas_src>

<mosaic_0001>
module attributes {stable_mosaic.version = 11 : i64} {
  func.func @lstm_recurrence_kernel(%arg0: i32, %arg1: i32, %arg2: memref<16x1xi32, #tpu.memory_space<vmem>>, %arg3: memref<4x16x32xf32, #tpu.memory_space<vmem>>, %arg4: memref<16x512xf32, #tpu.memory_space<vmem>>, %arg5: memref<32x512xf32, #tpu.memory_space<vmem>>, %arg6: memref<1x512xf32, #tpu.memory_space<vmem>>, %arg7: memref<128x512xf32, #tpu.memory_space<vmem>>, %arg8: memref<128x128xf32, #tpu.memory_space<vmem>>, %arg9: memref<128x128xf32, #tpu.memory_space<vmem>>, %arg10: memref<1x128xf32, #tpu.memory_space<vmem>>, %arg11: memref<128x128xf32, #tpu.memory_space<vmem>>, %arg12: memref<1x128xf32, #tpu.memory_space<vmem>>, %arg13: memref<16x128xf32, #tpu.memory_space<vmem>>, %arg14: memref<16x128xf32, #tpu.memory_space<vmem>>, %arg15: memref<16x128xf32, #tpu.memory_space<vmem>>, %arg16: memref<4x16x512xf32, #tpu.memory_space<vmem>>) attributes {dimension_semantics = [#tpu.dimension_semantics<parallel>, #tpu.dimension_semantics<arbitrary>], iteration_bounds = array<i64: 1, 2>, scalar_prefetch = 0 : i64, scratch_operands = 3 : i64, tpu.core_type = #tpu.core_type<tc>, window_params = [{transform_indices = @transform_0, window_bounds = array<i64: 16, 1>}, {transform_indices = @transform_1, window_bounds = array<i64: 4, 16, 32>}, {transform_indices = @transform_2, window_bounds = array<i64: 16, 512>}, {pipeline_mode = #tpu.pipeline_mode<synchronous>, transform_indices = @transform_3, window_bounds = array<i64: 32, 512>}, {pipeline_mode = #tpu.pipeline_mode<synchronous>, transform_indices = @transform_4, window_bounds = array<i64: 1, 512>}, {pipeline_mode = #tpu.pipeline_mode<synchronous>, transform_indices = @transform_5, window_bounds = array<i64: 128, 512>}, {pipeline_mode = #tpu.pipeline_mode<synchronous>, transform_indices = @transform_6, window_bounds = array<i64: 128, 128>}, {pipeline_mode = #tpu.pipeline_mode<synchronous>, transform_indices = @transform_7, window_bounds = array<i64: 128, 128>}, {pipeline_mode = #tpu.pipeline_mode<synchronous>, transform_indices = @transform_8, window_bounds = array<i64: 1, 128>}, {pipeline_mode = #tpu.pipeline_mode<synchronous>, transform_indices = @transform_9, window_bounds = array<i64: 128, 128>}, {pipeline_mode = #tpu.pipeline_mode<synchronous>, transform_indices = @transform_10, window_bounds = array<i64: 1, 128>}, {transform_indices = @transform_11, window_bounds = array<i64: 16, 128>}]} {
    %c0_i32 = arith.constant 0 : i32
    %0 = arith.cmpi eq, %arg1, %c0_i32 : i32
    %1 = arith.extui %0 : i1 to i32
    %c0_i32_0 = arith.constant 0 : i32
    %2 = arith.cmpi ne, %1, %c0_i32_0 : i32
    scf.if %2 {
      %cst_68 = arith.constant 0.000000e+00 : f32
      %195 = vector.broadcast %cst_68 : f32 to vector<16x128xf32>
      %c0_69 = arith.constant 0 : index
      %c0_70 = arith.constant 0 : index
      %196 = vector.load %arg14[%c0_69, %c0_70] : memref<16x128xf32, #tpu.memory_space<vmem>>, vector<16x128xf32>
      tpu.vector_store %arg14[%c0_69, %c0_70], %195 {strides = array<i32>} : memref<16x128xf32, #tpu.memory_space<vmem>>, vector<16x128xf32>,
      %cst_71 = arith.constant 0.000000e+00 : f32
      %197 = vector.broadcast %cst_71 : f32 to vector<16x128xf32>
      %c0_72 = arith.constant 0 : index
      %c0_73 = arith.constant 0 : index
      %198 = vector.load %arg15[%c0_72, %c0_73] : memref<16x128xf32, #tpu.memory_space<vmem>>, vector<16x128xf32>
      tpu.vector_store %arg15[%c0_72, %c0_73], %197 {strides = array<i32>} : memref<16x128xf32, #tpu.memory_space<vmem>>, vector<16x128xf32>,
    } else {
    }
    %c0 = arith.constant 0 : index
    %c0_1 = arith.constant 0 : index
    %3 = vector.load %arg5[%c0, %c0_1] : memref<32x512xf32, #tpu.memory_space<vmem>>, vector<32x512xf32>
    %c0_2 = arith.constant 0 : index
    %c0_3 = arith.constant 0 : index
    %4 = vector.load %arg7[%c0_2, %c0_3] : memref<128x512xf32, #tpu.memory_space<vmem>>, vector<128x512xf32>
    %c0_4 = arith.constant 0 : index
    %c0_5 = arith.constant 0 : index
    %5 = vector.load %arg6[%c0_4, %c0_5] : memref<1x512xf32, #tpu.memory_space<vmem>>, vector<1x512xf32>
    %6 = vector.shape_cast %5 : vector<1x512xf32> to vector<1x512xf32>
    %7 = vector.broadcast %6 : vector<1x512xf32> to vector<16x512xf32>
    %c0_6 = arith.constant 0 : index
    %c0_7 = arith.constant 0 : index
    %8 = vector.load %arg2[%c0_6, %c0_7] : memref<16x1xi32, #tpu.memory_space<vmem>>, vector<16x1xi32>
    %9 = vector.shape_cast %8 : vector<16x1xi32> to vector<16x1xi32>
    %10 = vector.broadcast %9 : vector<16x1xi32> to vector<16x128xi32>
    %c4_i32 = arith.constant 4 : i32
    %11 = arith.muli %arg1, %c4_i32 : i32
    %c0_i32_8 = arith.constant 0 : i32
    %12 = arith.index_cast %c0_i32_8 : i32 to index
    %c0_9 = arith.constant 0 : index
    %c0_10 = arith.constant 0 : index
    %13 = vector.load %arg3[%12, %c0_9, %c0_10] : memref<4x16x32xf32, #tpu.memory_space<vmem>>, vector<1x16x32xf32>
    %14 = vector.shape_cast %13 : vector<1x16x32xf32> to vector<16x32xf32>
    %cst = arith.constant dense<0.000000e+00> : vector<16x512xf32>
    %15 = tpu.matmul %14, %3, %cst {dimension_numbers = #tpu.dot_dimension_numbers<[1], [0], [0], [1], [0, 0, 1, 1], [], []>} : vector<16x32xf32>, vector<32x512xf32>, vector<16x512xf32> -> vector<16x512xf32>
    %16 = arith.addf %15, %7 : vector<16x512xf32>
    %17 = arith.index_cast %c0_i32_8 : i32 to index
    %c0_11 = arith.constant 0 : index
    %c0_12 = arith.constant 0 : index
    %18 = vector.load %arg16[%17, %c0_11, %c0_12] : memref<4x16x512xf32, #tpu.memory_space<vmem>>, vector<1x16x512xf32>
    %19 = vector.shape_cast %18 : vector<1x16x512xf32> to vector<16x512xf32>
    %20 = vector.shape_cast %16 : vector<16x512xf32> to vector<1x16x512xf32>
    tpu.vector_store %arg16[%17, %c0_11, %c0_12], %20 {strides = array<i32>} : memref<4x16x512xf32, #tpu.memory_space<vmem>>, vector<1x16x512xf32>,
    %c1_i32 = arith.constant 1 : i32
    %21 = arith.index_cast %c1_i32 : i32 to index
    %c0_13 = arith.constant 0 : index
    %c0_14 = arith.constant 0 : index
    %22 = vector.load %arg3[%21, %c0_13, %c0_14] : memref<4x16x32xf32, #tpu.memory_space<vmem>>, vector<1x16x32xf32>
    %23 = vector.shape_cast %22 : vector<1x16x32xf32> to vector<16x32xf32>
    %cst_15 = arith.constant dense<0.000000e+00> : vector<16x512xf32>
    %24 = tpu.matmul %23, %3, %cst_15 {dimension_numbers = #tpu.dot_dimension_numbers<[1], [0], [0], [1], [0, 0, 1, 1], [], []>} : vector<16x32xf32>, vector<32x512xf32>, vector<16x512xf32> -> vector<16x512xf32>
    %25 = arith.addf %24, %7 : vector<16x512xf32>
    %26 = arith.index_cast %c1_i32 : i32 to index
    %c0_16 = arith.constant 0 : index
    %c0_17 = arith.constant 0 : index
    %27 = vector.load %arg16[%26, %c0_16, %c0_17] : memref<4x16x512xf32, #tpu.memory_space<vmem>>, vector<1x16x512xf32>
    %28 = vector.shape_cast %27 : vector<1x16x512xf32> to vector<16x512xf32>
    %29 = vector.shape_cast %25 : vector<16x512xf32> to vector<1x16x512xf32>
    tpu.vector_store %arg16[%26, %c0_16, %c0_17], %29 {strides = array<i32>} : memref<4x16x512xf32, #tpu.memory_space<vmem>>, vector<1x16x512xf32>,
    %c2_i32 = arith.constant 2 : i32
    %30 = arith.index_cast %c2_i32 : i32 to index
    %c0_18 = arith.constant 0 : index
    %c0_19 = arith.constant 0 : index
    %31 = vector.load %arg3[%30, %c0_18, %c0_19] : memref<4x16x32xf32, #tpu.memory_space<vmem>>, vector<1x16x32xf32>
    %32 = vector.shape_cast %31 : vector<1x16x32xf32> to vector<16x32xf32>
    %cst_20 = arith.constant dense<0.000000e+00> : vector<16x512xf32>
    %33 = tpu.matmul %32, %3, %cst_20 {dimension_numbers = #tpu.dot_dimension_numbers<[1], [0], [0], [1], [0, 0, 1, 1], [], []>} : vector<16x32xf32>, vector<32x512xf32>, vector<16x512xf32> -> vector<16x512xf32>
    %34 = arith.addf %33, %7 : vector<16x512xf32>
    %35 = arith.index_cast %c2_i32 : i32 to index
    %c0_21 = arith.constant 0 : index
    %c0_22 = arith.constant 0 : index
    %36 = vector.load %arg16[%35, %c0_21, %c0_22] : memref<4x16x512xf32, #tpu.memory_space<vmem>>, vector<1x16x512xf32>
    %37 = vector.shape_cast %36 : vector<1x16x512xf32> to vector<16x512xf32>
    %38 = vector.shape_cast %34 : vector<16x512xf32> to vector<1x16x512xf32>
    tpu.vector_store %arg16[%35, %c0_21, %c0_22], %38 {strides = array<i32>} : memref<4x16x512xf32, #tpu.memory_space<vmem>>, vector<1x16x512xf32>,
    %c3_i32 = arith.constant 3 : i32
    %39 = arith.index_cast %c3_i32 : i32 to index
    %c0_23 = arith.constant 0 : index
    %c0_24 = arith.constant 0 : index
    %40 = vector.load %arg3[%39, %c0_23, %c0_24] : memref<4x16x32xf32, #tpu.memory_space<vmem>>, vector<1x16x32xf32>
    %41 = vector.shape_cast %40 : vector<1x16x32xf32> to vector<16x32xf32>
    %cst_25 = arith.constant dense<0.000000e+00> : vector<16x512xf32>
    %42 = tpu.matmul %41, %3, %cst_25 {dimension_numbers = #tpu.dot_dimension_numbers<[1], [0], [0], [1], [0, 0, 1, 1], [], []>} : vector<16x32xf32>, vector<32x512xf32>, vector<16x512xf32> -> vector<16x512xf32>
    %43 = arith.addf %42, %7 : vector<16x512xf32>
    %44 = arith.index_cast %c3_i32 : i32 to index
    %c0_26 = arith.constant 0 : index
    %c0_27 = arith.constant 0 : index
    %45 = vector.load %arg16[%44, %c0_26, %c0_27] : memref<4x16x512xf32, #tpu.memory_space<vmem>>, vector<1x16x512xf32>
    %46 = vector.shape_cast %45 : vector<1x16x512xf32> to vector<16x512xf32>
    %47 = vector.shape_cast %43 : vector<16x512xf32> to vector<1x16x512xf32>
    tpu.vector_store %arg16[%44, %c0_26, %c0_27], %47 {strides = array<i32>} : memref<4x16x512xf32, #tpu.memory_space<vmem>>, vector<1x16x512xf32>,
    %c4_i32_28 = arith.constant 4 : i32
    %c0_29 = arith.constant 0 : index
    %c0_30 = arith.constant 0 : index
    %48 = vector.load %arg14[%c0_29, %c0_30] : memref<16x128xf32, #tpu.memory_space<vmem>>, vector<16x128xf32>
    %c0_31 = arith.constant 0 : index
    %c0_32 = arith.constant 0 : index
    %49 = vector.load %arg15[%c0_31, %c0_32] : memref<16x128xf32, #tpu.memory_space<vmem>>, vector<16x128xf32>
    %c0_i32_33 = arith.constant 0 : i32
    %50 = arith.index_cast %c0_i32_33 : i32 to index
    %c0_34 = arith.constant 0 : index
    %c0_35 = arith.constant 0 : index
    %51 = vector.load %arg16[%50, %c0_34, %c0_35] : memref<4x16x512xf32, #tpu.memory_space<vmem>>, vector<1x16x512xf32>
    %52 = vector.shape_cast %51 : vector<1x16x512xf32> to vector<16x512xf32>
    %cst_36 = arith.constant dense<0.000000e+00> : vector<16x512xf32>
    %53 = tpu.matmul %48, %4, %cst_36 {dimension_numbers = #tpu.dot_dimension_numbers<[1], [0], [0], [1], [0, 0, 1, 1], [], []>} : vector<16x128xf32>, vector<128x512xf32>, vector<16x512xf32> -> vector<16x512xf32>
    %54 = arith.addf %52, %53 : vector<16x512xf32>
    %55 = vector.extract_strided_slice %54 {offsets = [0, 0], sizes = [16, 128], strides = [1, 1]} : vector<16x512xf32> to vector<16x128xf32>
    %56 = arith.negf %55 : vector<16x128xf32>
    %57 = math.exp %56 : vector<16x128xf32>
    %cst_37 = arith.constant 1.000000e+00 : f32
    %58 = vector.broadcast %cst_37 : f32 to vector<16x128xf32>
    %59 = arith.addf %58, %57 : vector<16x128xf32>
    %60 = arith.divf %58, %59 : vector<16x128xf32>
    %61 = vector.extract_strided_slice %54 {offsets = [0, 128], sizes = [16, 128], strides = [1, 1]} : vector<16x512xf32> to vector<16x128xf32>
    %62 = arith.negf %61 : vector<16x128xf32>
    %63 = math.exp %62 : vector<16x128xf32>
    %cst_38 = arith.constant 1.000000e+00 : f32
    %64 = vector.broadcast %cst_38 : f32 to vector<16x128xf32>
    %65 = arith.addf %64, %63 : vector<16x128xf32>
    %66 = arith.divf %64, %65 : vector<16x128xf32>
    %67 = vector.extract_strided_slice %54 {offsets = [0, 256], sizes = [16, 128], strides = [1, 1]} : vector<16x512xf32> to vector<16x128xf32>
    %68 = math.tanh %67 : vector<16x128xf32>
    %69 = vector.extract_strided_slice %54 {offsets = [0, 384], sizes = [16, 128], strides = [1, 1]} : vector<16x512xf32> to vector<16x128xf32>
    %70 = arith.negf %69 : vector<16x128xf32>
    %71 = math.exp %70 : vector<16x128xf32>
    %cst_39 = arith.constant 1.000000e+00 : f32
    %72 = vector.broadcast %cst_39 : f32 to vector<16x128xf32>
    %73 = arith.addf %72, %71 : vector<16x128xf32>
    %74 = arith.divf %72, %73 : vector<16x128xf32>
    %75 = arith.mulf %66, %49 : vector<16x128xf32>
    %76 = arith.mulf %60, %68 : vector<16x128xf32>
    %77 = arith.addf %75, %76 : vector<16x128xf32>
    %78 = math.tanh %77 : vector<16x128xf32>
    %79 = arith.mulf %74, %78 : vector<16x128xf32>
    %80 = arith.addi %11, %c0_i32_33 : i32
    %81 = vector.broadcast %80 : i32 to vector<16x128xi32>
    %82 = arith.cmpi sgt, %10, %81 : vector<16x128xi32>
    %83 = arith.select %82, %79, %48 : vector<16x128xi1>, vector<16x128xf32>
    %84 = arith.select %82, %77, %49 : vector<16x128xi1>, vector<16x128xf32>
    %c1_i32_40 = arith.constant 1 : i32
    %85 = arith.index_cast %c1_i32_40 : i32 to index
    %c0_41 = arith.constant 0 : index
    %c0_42 = arith.constant 0 : index
    %86 = vector.load %arg16[%85, %c0_41, %c0_42] : memref<4x16x512xf32, #tpu.memory_space<vmem>>, vector<1x16x512xf32>
    %87 = vector.shape_cast %86 : vector<1x16x512xf32> to vector<16x512xf32>
    %cst_43 = arith.constant dense<0.000000e+00> : vector<16x512xf32>
    %88 = tpu.matmul %83, %4, %cst_43 {dimension_numbers = #tpu.dot_dimension_numbers<[1], [0], [0], [1], [0, 0, 1, 1], [], []>} : vector<16x128xf32>, vector<128x512xf32>, vector<16x512xf32> -> vector<16x512xf32>
    %89 = arith.addf %87, %88 : vector<16x512xf32>
    %90 = vector.extract_strided_slice %89 {offsets = [0, 0], sizes = [16, 128], strides = [1, 1]} : vector<16x512xf32> to vector<16x128xf32>
    %91 = arith.negf %90 : vector<16x128xf32>
    %92 = math.exp %91 : vector<16x128xf32>
    %cst_44 = arith.constant 1.000000e+00 : f32
    %93 = vector.broadcast %cst_44 : f32 to vector<16x128xf32>
    %94 = arith.addf %93, %92 : vector<16x128xf32>
    %95 = arith.divf %93, %94 : vector<16x128xf32>
    %96 = vector.extract_strided_slice %89 {offsets = [0, 128], sizes = [16, 128], strides = [1, 1]} : vector<16x512xf32> to vector<16x128xf32>
    %97 = arith.negf %96 : vector<16x128xf32>
    %98 = math.exp %97 : vector<16x128xf32>
    %cst_45 = arith.constant 1.000000e+00 : f32
    %99 = vector.broadcast %cst_45 : f32 to vector<16x128xf32>
    %100 = arith.addf %99, %98 : vector<16x128xf32>
    %101 = arith.divf %99, %100 : vector<16x128xf32>
    %102 = vector.extract_strided_slice %89 {offsets = [0, 256], sizes = [16, 128], strides = [1, 1]} : vector<16x512xf32> to vector<16x128xf32>
    %103 = math.tanh %102 : vector<16x128xf32>
    %104 = vector.extract_strided_slice %89 {offsets = [0, 384], sizes = [16, 128], strides = [1, 1]} : vector<16x512xf32> to vector<16x128xf32>
    %105 = arith.negf %104 : vector<16x128xf32>
    %106 = math.exp %105 : vector<16x128xf32>
    %cst_46 = arith.constant 1.000000e+00 : f32
    %107 = vector.broadcast %cst_46 : f32 to vector<16x128xf32>
    %108 = arith.addf %107, %106 : vector<16x128xf32>
    %109 = arith.divf %107, %108 : vector<16x128xf32>
    %110 = arith.mulf %101, %84 : vector<16x128xf32>
    %111 = arith.mulf %95, %103 : vector<16x128xf32>
    %112 = arith.addf %110, %111 : vector<16x128xf32>
    %113 = math.tanh %112 : vector<16x128xf32>
    %114 = arith.mulf %109, %113 : vector<16x128xf32>
    %115 = arith.addi %11, %c1_i32_40 : i32
    %116 = vector.broadcast %115 : i32 to vector<16x128xi32>
    %117 = arith.cmpi sgt, %10, %116 : vector<16x128xi32>
    %118 = arith.select %117, %114, %83 : vector<16x128xi1>, vector<16x128xf32>
    %119 = arith.select %117, %112, %84 : vector<16x128xi1>, vector<16x128xf32>
    %c2_i32_47 = arith.constant 2 : i32
    %120 = arith.index_cast %c2_i32_47 : i32 to index
    %c0_48 = arith.constant 0 : index
    %c0_49 = arith.constant 0 : index
    %121 = vector.load %arg16[%120, %c0_48, %c0_49] : memref<4x16x512xf32, #tpu.memory_space<vmem>>, vector<1x16x512xf32>
    %122 = vector.shape_cast %121 : vector<1x16x512xf32> to vector<16x512xf32>
    %cst_50 = arith.constant dense<0.000000e+00> : vector<16x512xf32>
    %123 = tpu.matmul %118, %4, %cst_50 {dimension_numbers = #tpu.dot_dimension_numbers<[1], [0], [0], [1], [0, 0, 1, 1], [], []>} : vector<16x128xf32>, vector<128x512xf32>, vector<16x512xf32> -> vector<16x512xf32>
    %124 = arith.addf %122, %123 : vector<16x512xf32>
    %125 = vector.extract_strided_slice %124 {offsets = [0, 0], sizes = [16, 128], strides = [1, 1]} : vector<16x512xf32> to vector<16x128xf32>
    %126 = arith.negf %125 : vector<16x128xf32>
    %127 = math.exp %126 : vector<16x128xf32>
    %cst_51 = arith.constant 1.000000e+00 : f32
    %128 = vector.broadcast %cst_51 : f32 to vector<16x128xf32>
    %129 = arith.addf %128, %127 : vector<16x128xf32>
    %130 = arith.divf %128, %129 : vector<16x128xf32>
    %131 = vector.extract_strided_slice %124 {offsets = [0, 128], sizes = [16, 128], strides = [1, 1]} : vector<16x512xf32> to vector<16x128xf32>
    %132 = arith.negf %131 : vector<16x128xf32>
    %133 = math.exp %132 : vector<16x128xf32>
    %cst_52 = arith.constant 1.000000e+00 : f32
    %134 = vector.broadcast %cst_52 : f32 to vector<16x128xf32>
    %135 = arith.addf %134, %133 : vector<16x128xf32>
    %136 = arith.divf %134, %135 : vector<16x128xf32>
    %137 = vector.extract_strided_slice %124 {offsets = [0, 256], sizes = [16, 128], strides = [1, 1]} : vector<16x512xf32> to vector<16x128xf32>
    %138 = math.tanh %137 : vector<16x128xf32>
    %139 = vector.extract_strided_slice %124 {offsets = [0, 384], sizes = [16, 128], strides = [1, 1]} : vector<16x512xf32> to vector<16x128xf32>
    %140 = arith.negf %139 : vector<16x128xf32>
    %141 = math.exp %140 : vector<16x128xf32>
    %cst_53 = arith.constant 1.000000e+00 : f32
    %142 = vector.broadcast %cst_53 : f32 to vector<16x128xf32>
    %143 = arith.addf %142, %141 : vector<16x128xf32>
    %144 = arith.divf %142, %143 : vector<16x128xf32>
    %145 = arith.mulf %136, %119 : vector<16x128xf32>
    %146 = arith.mulf %130, %138 : vector<16x128xf32>
    %147 = arith.addf %145, %146 : vector<16x128xf32>
    %148 = math.tanh %147 : vector<16x128xf32>
    %149 = arith.mulf %144, %148 : vector<16x128xf32>
    %150 = arith.addi %11, %c2_i32_47 : i32
    %151 = vector.broadcast %150 : i32 to vector<16x128xi32>
    %152 = arith.cmpi sgt, %10, %151 : vector<16x128xi32>
    %153 = arith.select %152, %149, %118 : vector<16x128xi1>, vector<16x128xf32>
    %154 = arith.select %152, %147, %119 : vector<16x128xi1>, vector<16x128xf32>
    %c3_i32_54 = arith.constant 3 : i32
    %155 = arith.index_cast %c3_i32_54 : i32 to index
    %c0_55 = arith.constant 0 : index
    %c0_56 = arith.constant 0 : index
    %156 = vector.load %arg16[%155, %c0_55, %c0_56] : memref<4x16x512xf32, #tpu.memory_space<vmem>>, vector<1x16x512xf32>
    %157 = vector.shape_cast %156 : vector<1x16x512xf32> to vector<16x512xf32>
    %cst_57 = arith.constant dense<0.000000e+00> : vector<16x512xf32>
    %158 = tpu.matmul %153, %4, %cst_57 {dimension_numbers = #tpu.dot_dimension_numbers<[1], [0], [0], [1], [0, 0, 1, 1], [], []>} : vector<16x128xf32>, vector<128x512xf32>, vector<16x512xf32> -> vector<16x512xf32>
    %159 = arith.addf %157, %158 : vector<16x512xf32>
    %160 = vector.extract_strided_slice %159 {offsets = [0, 0], sizes = [16, 128], strides = [1, 1]} : vector<16x512xf32> to vector<16x128xf32>
    %161 = arith.negf %160 : vector<16x128xf32>
    %162 = math.exp %161 : vector<16x128xf32>
    %cst_58 = arith.constant 1.000000e+00 : f32
    %163 = vector.broadcast %cst_58 : f32 to vector<16x128xf32>
    %164 = arith.addf %163, %162 : vector<16x128xf32>
    %165 = arith.divf %163, %164 : vector<16x128xf32>
    %166 = vector.extract_strided_slice %159 {offsets = [0, 128], sizes = [16, 128], strides = [1, 1]} : vector<16x512xf32> to vector<16x128xf32>
    %167 = arith.negf %166 : vector<16x128xf32>
    %168 = math.exp %167 : vector<16x128xf32>
    %cst_59 = arith.constant 1.000000e+00 : f32
    %169 = vector.broadcast %cst_59 : f32 to vector<16x128xf32>
    %170 = arith.addf %169, %168 : vector<16x128xf32>
    %171 = arith.divf %169, %170 : vector<16x128xf32>
    %172 = vector.extract_strided_slice %159 {offsets = [0, 256], sizes = [16, 128], strides = [1, 1]} : vector<16x512xf32> to vector<16x128xf32>
    %173 = math.tanh %172 : vector<16x128xf32>
    %174 = vector.extract_strided_slice %159 {offsets = [0, 384], sizes = [16, 128], strides = [1, 1]} : vector<16x512xf32> to vector<16x128xf32>
    %175 = arith.negf %174 : vector<16x128xf32>
    %176 = math.exp %175 : vector<16x128xf32>
    %cst_60 = arith.constant 1.000000e+00 : f32
    %177 = vector.broadcast %cst_60 : f32 to vector<16x128xf32>
    %178 = arith.addf %177, %176 : vector<16x128xf32>
    %179 = arith.divf %177, %178 : vector<16x128xf32>
    %180 = arith.mulf %171, %154 : vector<16x128xf32>
    %181 = arith.mulf %165, %173 : vector<16x128xf32>
    %182 = arith.addf %180, %181 : vector<16x128xf32>
    %183 = math.tanh %182 : vector<16x128xf32>
    %184 = arith.mulf %179, %183 : vector<16x128xf32>
    %185 = arith.addi %11, %c3_i32_54 : i32
    %186 = vector.broadcast %185 : i32 to vector<16x128xi32>
    %187 = arith.cmpi sgt, %10, %186 : vector<16x128xi32>
    %188 = arith.select %187, %184, %153 : vector<16x128xi1>, vector<16x128xf32>
    %189 = arith.select %187, %182, %154 : vector<16x128xi1>, vector<16x128xf32>
    %c4_i32_61 = arith.constant 4 : i32
    %c0_62 = arith.constant 0 : index
    %c0_63 = arith.constant 0 : index
    %190 = vector.load %arg14[%c0_62, %c0_63] : memref<16x128xf32, #tpu.memory_space<vmem>>, vector<16x128xf32>
    tpu.vector_store %arg14[%c0_62, %c0_63], %188 {strides = array<i32>} : memref<16x128xf32, #tpu.memory_space<vmem>>, vector<16x128xf32>,
    %c0_64 = arith.constant 0 : index
    %c0_65 = arith.constant 0 : index
    %191 = vector.load %arg15[%c0_64, %c0_65] : memref<16x128xf32, #tpu.memory_space<vmem>>, vector<16x128xf32>
    tpu.vector_store %arg15[%c0_64, %c0_65], %189 {strides = array<i32>} : memref<16x128xf32, #tpu.memory_space<vmem>>, vector<16x128xf32>,
    %c1_i32_66 = arith.constant 1 : i32
    %192 = arith.cmpi eq, %arg1, %c1_i32_66 : i32
    %193 = arith.extui %192 : i1 to i32
    %c0_i32_67 = arith.constant 0 : i32
    %194 = arith.cmpi ne, %193, %c0_i32_67 : i32
    scf.if %194 {
      %c0_68 = arith.constant 0 : index
      %c0_69 = arith.constant 0 : index
      %195 = vector.load %arg4[%c0_68, %c0_69] : memref<16x512xf32, #tpu.memory_space<vmem>>, vector<16x512xf32>
      %196 = vector.extract_strided_slice %195 {offsets = [0, 0], sizes = [16, 128], strides = [1, 1]} : vector<16x512xf32> to vector<16x128xf32>
      %197 = arith.negf %196 : vector<16x128xf32>
      %198 = math.exp %197 : vector<16x128xf32>
      %cst_70 = arith.constant 1.000000e+00 : f32
      %199 = vector.broadcast %cst_70 : f32 to vector<16x128xf32>
      %200 = arith.addf %199, %198 : vector<16x128xf32>
      %201 = arith.divf %199, %200 : vector<16x128xf32>
      %202 = vector.extract_strided_slice %195 {offsets = [0, 256], sizes = [16, 128], strides = [1, 1]} : vector<16x512xf32> to vector<16x128xf32>
      %203 = math.tanh %202 : vector<16x128xf32>
      %204 = vector.extract_strided_slice %195 {offsets = [0, 384], sizes = [16, 128], strides = [1, 1]} : vector<16x512xf32> to vector<16x128xf32>
      %205 = arith.negf %204 : vector<16x128xf32>
      %206 = math.exp %205 : vector<16x128xf32>
      %cst_71 = arith.constant 1.000000e+00 : f32
      %207 = vector.broadcast %cst_71 : f32 to vector<16x128xf32>
      %208 = arith.addf %207, %206 : vector<16x128xf32>
      %209 = arith.divf %207, %208 : vector<16x128xf32>
      %210 = arith.mulf %201, %203 : vector<16x128xf32>
      %211 = math.tanh %210 : vector<16x128xf32>
      %212 = arith.mulf %209, %211 : vector<16x128xf32>
      %c0_72 = arith.constant 0 : index
      %c0_73 = arith.constant 0 : index
      %213 = vector.load %arg8[%c0_72, %c0_73] : memref<128x128xf32, #tpu.memory_space<vmem>>, vector<128x128xf32>
      %cst_74 = arith.constant dense<0.000000e+00> : vector<16x128xf32>
      %214 = tpu.matmul %188, %213, %cst_74 {dimension_numbers = #tpu.dot_dimension_numbers<[1], [0], [0], [1], [0, 0, 1, 1], [], []>} : vector<16x128xf32>, vector<128x128xf32>, vector<16x128xf32> -> vector<16x128xf32>
      %c0_75 = arith.constant 0 : index
      %c0_76 = arith.constant 0 : index
      %215 = vector.load %arg9[%c0_75, %c0_76] : memref<128x128xf32, #tpu.memory_space<vmem>>, vector<128x128xf32>
      %cst_77 = arith.constant dense<0.000000e+00> : vector<16x128xf32>
      %216 = tpu.matmul %212, %215, %cst_77 {dimension_numbers = #tpu.dot_dimension_numbers<[1], [0], [0], [1], [0, 0, 1, 1], [], []>} : vector<16x128xf32>, vector<128x128xf32>, vector<16x128xf32> -> vector<16x128xf32>
      %217 = arith.addf %214, %216 : vector<16x128xf32>
      %c0_78 = arith.constant 0 : index
      %c0_79 = arith.constant 0 : index
      %218 = vector.load %arg10[%c0_78, %c0_79] : memref<1x128xf32, #tpu.memory_space<vmem>>, vector<1x128xf32>
      %219 = vector.broadcast %218 : vector<1x128xf32> to vector<16x128xf32>
      %220 = arith.addf %217, %219 : vector<16x128xf32>
      %cst_80 = arith.constant 0.000000e+00 : f32
      %221 = vector.broadcast %cst_80 : f32 to vector<16x128xf32>
      %222 = arith.maximumf %220, %221 : vector<16x128xf32>
      %c0_81 = arith.constant 0 : index
      %c0_82 = arith.constant 0 : index
      %223 = vector.load %arg11[%c0_81, %c0_82] : memref<128x128xf32, #tpu.memory_space<vmem>>, vector<128x128xf32>
      %cst_83 = arith.constant dense<0.000000e+00> : vector<16x128xf32>
      %224 = tpu.matmul %222, %223, %cst_83 {dimension_numbers = #tpu.dot_dimension_numbers<[1], [0], [0], [1], [0, 0, 1, 1], [], []>} : vector<16x128xf32>, vector<128x128xf32>, vector<16x128xf32> -> vector<16x128xf32>
      %c0_84 = arith.constant 0 : index
      %c0_85 = arith.constant 0 : index
      %225 = vector.load %arg12[%c0_84, %c0_85] : memref<1x128xf32, #tpu.memory_space<vmem>>, vector<1x128xf32>
      %226 = vector.broadcast %225 : vector<1x128xf32> to vector<16x128xf32>
      %227 = arith.addf %224, %226 : vector<16x128xf32>
      %c0_86 = arith.constant 0 : index
      %c0_87 = arith.constant 0 : index
      %228 = vector.load %arg13[%c0_86, %c0_87] : memref<16x128xf32, #tpu.memory_space<vmem>>, vector<16x128xf32>
      tpu.vector_store %arg13[%c0_86, %c0_87], %227 {strides = array<i32>} : memref<16x128xf32, #tpu.memory_space<vmem>>, vector<16x128xf32>,
    } else {
    }
    return
  }
  func.func @transform_0(%arg0: i32, %arg1: i32) -> (i32, i32) {
    %c0_i32 = arith.constant 0 : i32
    %c0_i32_0 = arith.constant 0 : i32
    return %arg0, %c0_i32 : i32, i32
  }
  func.func @transform_1(%arg0: i32, %arg1: i32) -> (i32, i32, i32) {
    %c0_i32 = arith.constant 0 : i32
    %c0_i32_0 = arith.constant 0 : i32
    return %arg1, %arg0, %c0_i32 : i32, i32, i32
  }
  func.func @transform_2(%arg0: i32, %arg1: i32) -> (i32, i32) {
    %c0_i32 = arith.constant 0 : i32
    %c0_i32_0 = arith.constant 0 : i32
    return %arg0, %c0_i32 : i32, i32
  }
  func.func @transform_3(%arg0: i32, %arg1: i32) -> (i32, i32) {
    %c0_i32 = arith.constant 0 : i32
    %c0_i32_0 = arith.constant 0 : i32
    %c0_i32_1 = arith.constant 0 : i32
    return %c0_i32, %c0_i32_0 : i32, i32
  }
  func.func @transform_4(%arg0: i32, %arg1: i32) -> (i32, i32) {
    %c0_i32 = arith.constant 0 : i32
    %c0_i32_0 = arith.constant 0 : i32
    %c0_i32_1 = arith.constant 0 : i32
    return %c0_i32, %c0_i32_0 : i32, i32
  }
  func.func @transform_5(%arg0: i32, %arg1: i32) -> (i32, i32) {
    %c0_i32 = arith.constant 0 : i32
    %c0_i32_0 = arith.constant 0 : i32
    %c0_i32_1 = arith.constant 0 : i32
    return %c0_i32, %c0_i32_0 : i32, i32
  }
  func.func @transform_6(%arg0: i32, %arg1: i32) -> (i32, i32) {
    %c0_i32 = arith.constant 0 : i32
    %c0_i32_0 = arith.constant 0 : i32
    %c0_i32_1 = arith.constant 0 : i32
    return %c0_i32, %c0_i32_0 : i32, i32
  }
  func.func @transform_7(%arg0: i32, %arg1: i32) -> (i32, i32) {
    %c0_i32 = arith.constant 0 : i32
    %c0_i32_0 = arith.constant 0 : i32
    %c0_i32_1 = arith.constant 0 : i32
    return %c0_i32, %c0_i32_0 : i32, i32
  }
  func.func @transform_8(%arg0: i32, %arg1: i32) -> (i32, i32) {
    %c0_i32 = arith.constant 0 : i32
    %c0_i32_0 = arith.constant 0 : i32
    %c0_i32_1 = arith.constant 0 : i32
    return %c0_i32, %c0_i32_0 : i32, i32
  }
  func.func @transform_9(%arg0: i32, %arg1: i32) -> (i32, i32) {
    %c0_i32 = arith.constant 0 : i32
    %c0_i32_0 = arith.constant 0 : i32
    %c0_i32_1 = arith.constant 0 : i32
    return %c0_i32, %c0_i32_0 : i32, i32
  }
  func.func @transform_10(%arg0: i32, %arg1: i32) -> (i32, i32) {
    %c0_i32 = arith.constant 0 : i32
    %c0_i32_0 = arith.constant 0 : i32
    %c0_i32_1 = arith.constant 0 : i32
    return %c0_i32, %c0_i32_0 : i32, i32
  }
  func.func @transform_11(%arg0: i32, %arg1: i32) -> (i32, i32) {
    %c0_i32 = arith.constant 0 : i32
    %c0_i32_0 = arith.constant 0 : i32
    return %arg0, %c0_i32 : i32, i32
  }
}

</mosaic_0001>

<bundles_post_ra>
// kernel: lstm_model_forward.1
= control target key start
LH: loop header
LB: loop body
LE: loop exit
PB: predicated region body
PF: predicated region fallthrough
CT: control target
= control target key end

     0   :  { %s3595_s17 = smov 0   ;;  %s3597_s18 = smov 0   ;;  %s4515_s0 = inlined_call_operand.vmem [shape: s32[16,1], index: 0, kind: input, shape index: {}]   ;;  %s4516_s1 = inlined_call_operand.vmem [shape: f32[8,16,32], index: 1, kind: input, shape index: {}]   ;;  %s4517_s2 = inlined_call_operand.vmem [shape: f32[16,512], index: 2, kind: input, shape index: {}]   ;;  %s4518_s3 = inlined_call_operand.vmem [shape: f32[32,512], index: 3, kind: input, shape index: {}]   ;;  %s4519_s4 = inlined_call_operand.vmem [shape: f32[1,512], index: 4, kind: input, shape index: {}]   ;;  %s4520_s5 = inlined_call_operand.vmem [shape: f32[128,512], index: 5, kind: input, shape index: {}]   ;;  %s4521_s6 = inlined_call_operand.vmem [shape: f32[128,128], index: 6, kind: input, shape index: {}]   ;;  %s4522_s7 = inlined_call_operand.vmem [shape: f32[128,128], index: 7, kind: input, shape index: {}]   ;;  %s4523_s8 = inlined_call_operand.vmem [shape: f32[1,128], index: 8, kind: input, shape index: {}]   ;;  %s4524_s9 = inlined_call_operand.vmem [shape: f32[128,128], index: 9, kind: input, shape index: {}]   ;;  %s4525_s10 = inlined_call_operand.vmem [shape: f32[1,128], index: 10, kind: input, shape index: {}]   ;;  %s4526_s11 = inlined_call_operand.vmem [shape: f32[16,128], index: 11, kind: output, shape index: {}]  }
   0x1   :  { %s3599_s19 = smov 0  }
   0x2 LB: > { %s30_s20 = sadd.s32 1, %s3526_s18  ;;  %p2623_p0 = scmp.ge.s32.totalorder %s3530_s19, 1  ;;  %s3530_s19 = sphi %s3599_s19, %s21_s19   ;;  %s3526_s18 = sphi %s3597_s18, %s4532_s18   ;;  %s3522_s17 = sphi %s3595_s17, %s4531_s17  }
   0x3   : > { %p31_p1 = scmp.ge.s32.totalorder %s30_s20, 2  ;;  %p381_p2 = scmp.lt.s32.totalorder %s3530_s19, 3 }
   0x5   : > { %s4534_s20 = smov (%p31_p1, %s30_s20), 0  ;;  %p382_p3 = pnand %p2623_p0, %p381_p2 }
   0x6   : > { %s3616_s21 = sshll.u32 (!%p382_p3), %s3522_s17, 2  ;;  %p2627_p5 = scmp.ne.s32.totalorder (!%p382_p3), %s3522_s17, 0 }
   0x7   : > { %385 = sbr.rel (%p382_p3) target bundleno = 1625 (0x659), region = 64  ;;  %p445_p4 = scmp.lt.s32.totalorder (!%p382_p3), %s3616_s21, 7 }
   0xe   : > { %s446_s22 = scalar_select %p445_p4, %s3616_s21, 7 }
   0xf   : > { %471 = sbr.rel (%p2627_p5) target bundleno = 22 (0x16), region = 68  ;;  %v3532_v0 = vmov (!%p2627_p5), 0.0  }
  0x10   : > { %s2686_s23 = sshll.u32 %s446_s22, 4  ;;  %472 = vst [vmem:[#allocation2] sm:$0xff] (!%p2627_p5), %v3532_v0  ;;  %473 = vst [vmem:[#allocation2 + $0x8] sm:$0xff] (!%p2627_p5), %v3532_v0 }
  0x11   : > { %s3623_s26 = scalar_lea.vmem %s4516_s1, %s2686_s23  ;;  %474 = vst [vmem:[#allocation3] sm:$0xff] (!%p2627_p5), %v3532_v0  ;;  %475 = vst [vmem:[#allocation3 + $0x8] sm:$0xff] (!%p2627_p5), %v3532_v0 }
  0x16 PF: > { %v477_v1 = vld [vmem:[%s4518_s3 + $0x8] sm:$0xff]  ;;  %v479_v3 = vld [vmem:[%s4518_s3 + $0x18] sm:$0xff]  ;;  %v476_v6 = vld [vmem:[%s4518_s3] sm:$0xff]  ;;  %v3533_v8 = vmov 0.0   ;;  %v3534_v14 = vmov 0   ;;  %vm589_vm0 = vcmask 261120  }
  0x17   : > { %v481_v2 = vld [vmem:[%s4518_s3 + $0x28] sm:$0xff]  ;;  %v483_v5 = vld [vmem:[%s4518_s3 + $0x38] sm:$0xff]  ;;  %v480_v7 = vld [vmem:[%s4518_s3 + $0x20] sm:$0xff]  ;;  %660 = vmatprep.mubr.f32.mxu0 %v3533_v8  ;;  %737 = vmatprep.mubr.f32.mxu1 %v3533_v8  ;;  %s1721_s30 = sadd.s32 1, %s3616_s21  ;;  %s1947_s12 = sadd.s32 2, %s3616_s21 }
  0x18   : > { %v3635_v4 = vpack.c.bf16 %v481_v2, %v477_v1  ;;  %v3648_v9 = vpack.c.bf16 %v483_v5, %v479_v3  ;;  %v3650_v10 = vpack.c.bf16 %v480_v7, %v476_v6  ;;  %v478_v11 = vld [vmem:[%s4518_s3 + $0x10] sm:$0xff]  ;;  %v485_v13 = vld [vmem:[%s4518_s3 + $0x48] sm:$0xff]  ;;  %3355 = vset.pattern.permute.xlu0 %v3534_v14  ;;  %v487_v17 = vld [vmem:[%s4518_s3 + $0x58] sm:$0xff]  ;;  %s2173_s13 = sadd.s32 3, %s3616_s21  ;;  %p2675_p6 = scmp.ne.s32.totalorder %s3522_s17, 1 }
  0x19   : > { %v482_v12 = vld [vmem:[%s4518_s3 + $0x30] sm:$0xff]  ;;  %v489_v16 = vld [vmem:[%s4518_s3 + $0x68] sm:$0xff]  ;;  %v491_v18 = vld [vmem:[%s4518_s3 + $0x78] sm:$0xff] }
  0x1a   : > { %2847 = vmatprep.subr.bf16.mxu0 %v3635_v4  ;;  %v3662_v15 = vpack.c.bf16 %v482_v12, %v478_v11  ;;  %2855 = vmatprep.subr.bf16.mxu1 %v3648_v9  ;;  %v3675_v19 = vpack.c.bf16 %v489_v16, %v485_v13  ;;  %v3677_v20 = vpack.c.bf16 %v491_v18, %v487_v17  ;;  %v484_v21 = vld [vmem:[%s4518_s3 + $0x40] sm:$0xff]  ;;  %v486_v23 = vld [vmem:[%s4518_s3 + $0x50] sm:$0xff]  ;;  %v588_v28 = vld [vmem:[%s3623_s26 + $0x8] sm:$0xff] }
  0x1b   : > { %2849 = vmatpush1.bf16.msra.mxu0 %v3650_v10  ;;  %v488_v22 = vld [vmem:[%s4518_s3 + $0x60] sm:$0xff]  ;;  %v490_v25 = vld [vmem:[%s4518_s3 + $0x70] sm:$0xff]  ;;  %v2634_v30 = vld [vmem:[%s3623_s26 + $0x18] sm:$0xff] }
  0x1c   : > { %2857 = vmatpush1.bf16.msra.mxu1 %v3662_v15  ;;  %v3689_v24 = vpack.c.bf16 %v488_v22, %v484_v21  ;;  %2851 = vmatprep.subr.bf16.mxu0 %v3675_v19  ;;  %v3696_v26 = vpack.c.bf16 %v490_v25, %v486_v23  ;;  %v587_v27 = vld [vmem:[%s3623_s26] sm:$0xff]  ;;  %v2633_v29 = vld [vmem:[%s3623_s26 + $0x10] sm:$0xff]  ;;  %v493_v32 = vld [vmem:[%s4520_s5 + $0x8] sm:$0xff] }
  0x1d   : > { %2859 = vmatprep.subr.bf16.mxu1 %v3677_v20  ;;  %v2639_v31 = vld [vmem:[%s3623_s26 + $0x20] sm:$0xff]  ;;  %v497_v33 = vld [vmem:[%s4520_s5 + $0x28] sm:$0xff]  ;;  %v495_v35 = vld [vmem:[%s4520_s5 + $0x18] sm:$0xff] }
  0x1e   : > { %v2640_v34 = vld [vmem:[%s3623_s26 + $0x28] sm:$0xff]  ;;  %v499_v36 = vld [vmem:[%s4520_s5 + $0x38] sm:$0xff]  ;;  %v492_v37 = vld [vmem:[%s4520_s5] sm:$0xff]  ;;  %v3768_v40 = vpack.c.bf16 %v497_v33, %v493_v32 }
  0x1f   : > { %2853 = vmatpush1.bf16.msra.mxu0 %v3689_v24  ;;  %v496_v38 = vld [vmem:[%s4520_s5 + $0x20] sm:$0xff]  ;;  %v494_v39 = vld [vmem:[%s4520_s5 + $0x10] sm:$0xff]  ;;  %v501_v42 = vld [vmem:[%s4520_s5 + $0x48] sm:$0xff]  ;;  %v3781_v44 = vpack.c.bf16 %v499_v36, %v495_v35 }
  0x20   : > { %2861 = vmatpush1.bf16.msra.mxu1 %v3696_v26  ;;  %2863 = vmatprep.subr.bf16.mxu0 %v3635_v4  ;;  %v498_v41 = vld [vmem:[%s4520_s5 + $0x30] sm:$0xff]  ;;  %v505_v43 = vld [vmem:[%s4520_s5 + $0x68] sm:$0xff]  ;;  %v503_v45 = vld [vmem:[%s4520_s5 + $0x58] sm:$0xff]  ;;  %v3792_v48 = vpack.c.bf16 %v496_v38, %v492_v37 }
  0x21   : > { %2871 = vmatprep.subr.bf16.mxu1 %v3648_v9  ;;  %v507_v46 = vld [vmem:[%s4520_s5 + $0x78] sm:$0xff]  ;;  %v2645_v47 = vld [vmem:[%s3623_s26 + $0x30] sm:$0xff]  ;;  %v3796_v49 = vpack.c.bf16 %v498_v41, %v494_v39  ;;  %v3798_v50 = vpack.c.bf16 %v505_v43, %v501_v42  ;;  %v500_v51 = vld [vmem:[%s4520_s5 + $0x40] sm:$0xff] }
  0x22   : > { %2629 = vmatmul.mubr.msk.f32.vlgmr.msra.gmra.mrb[0].mxu0 %vm589_vm0, %v587_v27  ;;  %v504_v52 = vld [vmem:[%s4520_s5 + $0x60] sm:$0xff]  ;;  %v502_v53 = vld [vmem:[%s4520_s5 + $0x50] sm:$0xff]  ;;  %v3811_v54 = vpack.c.bf16 %v507_v46, %v503_v45  ;;  %v509_v56 = vld [vmem:[%s4520_s5 + $0x88] sm:$0xff] }
  0x23   : > { %2631 = vmatmul.mubr.msk.f32.vlgmr.msra.gmra.mrb[0].mxu1 %vm589_vm0, %v587_v27  ;;  %2865 = vmatpush1.bf16.msra.mxu0 %v3650_v10  ;;  %v506_v55 = vld [vmem:[%s4520_s5 + $0x70] sm:$0xff]  ;;  %v513_v57 = vld [vmem:[%s4520_s5 + $0xa8] sm:$0xff]  ;;  %v511_v58 = vld [vmem:[%s4520_s5 + $0x98] sm:$0xff]  ;;  %v3832_v60 = vpack.c.bf16 %v504_v52, %v500_v51 }
  0x24   : > { %2873 = vmatpush1.bf16.msra.mxu1 %v3662_v15  ;;  %666 = vmatprep.mubr.f32.mxu0 %v3533_v8  ;;  %v515_v59 = vld [vmem:[%s4520_s5 + $0xb8] sm:$0xff]  ;;  %v3837_v62 = vpack.c.bf16 %v506_v55, %v502_v53  ;;  %v3839_v63 = vpack.c.bf16 %v513_v57, %v509_v56  ;;  %v508_v0 = vld [vmem:[%s4520_s5 + $0x80] sm:$0xff]  ;;  %v510_v2 = vld [vmem:[%s4520_s5 + $0x90] sm:$0xff] }
  0x25   : > { %743 = vmatprep.mubr.f32.mxu1 %v3533_v8  ;;  %2867 = vmatprep.subr.bf16.mxu0 %v3675_v19  ;;  %v2646_v61 = vld [vmem:[%s3623_s26 + $0x38] sm:$0xff]  ;;  %v512_v1 = vld [vmem:[%s4520_s5 + $0xa0] sm:$0xff]  ;;  %v3851_v3 = vpack.c.bf16 %v515_v59, %v511_v58  ;;  %v517_v5 = vld [vmem:[%s4520_s5 + $0xc8] sm:$0xff] }
  0x26   : > { %2875 = vmatprep.subr.bf16.mxu1 %v3677_v20  ;;  %2630 = vmatmul.mubr.msk.f32.gmra.mrb[2].mxu0 %vm589_vm0, %v588_v28  ;;  %v521_v6 = vld [vmem:[%s4520_s5 + $0xe8] sm:$0xff]  ;;  %v519_v7 = vld [vmem:[%s4520_s5 + $0xd8] sm:$0xff]  ;;  %v578_v11 = vld [vmem:[%s4515_s0] sm:$0xff] }
  0x27   : > { %2632 = vmatmul.mubr.msk.f32.gmra.mrb[2].mxu1 %vm589_vm0, %v588_v28  ;;  %2869 = vmatpush1.bf16.msra.mxu0 %v3689_v24  ;;  %v3882_v13 = vpack.c.bf16 %v521_v6, %v517_v5  ;;  %v516_v14 = vld [vmem:[%s4520_s5 + $0xc0] sm:$0xff]  ;;  %v518_v16 = vld [vmem:[%s4520_s5 + $0xd0] sm:$0xff]  ;;  %v527_v21 = vld [vmem:[%s4520_s5 + $0x118] sm:$0xff] }
  0x28   : > { %2877 = vmatpush1.bf16.msra.mxu1 %v3696_v26  ;;  %831 = vmatprep.mubr.f32.mxu0 %v3533_v8  ;;  %v522_v18 = vld [vmem:[%s4520_s5 + $0xf0] sm:$0xff]  ;;  %v531_v22 = vld [vmem:[%s4520_s5 + $0x138] sm:$0xff]  ;;  %v524_v27 = vld [vmem:[%s4520_s5 + $0x100] sm:$0xff] }
  0x29   : > { %908 = vmatprep.mubr.f32.mxu1 %v3533_v8  ;;  %2879 = vmatprep.subr.bf16.mxu0 %v3635_v4  ;;  %v3921_v25 = vpack.c.bf16 %v522_v18, %v518_v16  ;;  %v528_v28 = vld [vmem:[%s4520_s5 + $0x120] sm:$0xff]  ;;  %v533_v32 = vld [vmem:[%s4520_s5 + $0x148] sm:$0xff]  ;;  %v539_v35 = vld [vmem:[%s4520_s5 + $0x178] sm:$0xff] }
  0x2a   : > { %2887 = vmatprep.subr.bf16.mxu1 %v3648_v9  ;;  %2635 = vmatmul.mubr.msk.f32.vlgmr.msra.gmra.mrb[4].mxu0 %vm589_vm0, %v2633_v29  ;;  %v537_v33 = vld [vmem:[%s4520_s5 + $0x168] sm:$0xff]  ;;  %v3953_v36 = vpack.c.bf16 %v528_v28, %v524_v27  ;;  %v532_v39 = vld [vmem:[%s4520_s5 + $0x140] sm:$0xff]  ;;  %v534_v42 = vld [vmem:[%s4520_s5 + $0x150] sm:$0xff] }
  0x2b   : > { %2637 = vmatmul.mubr.msk.f32.vlgmr.msra.gmra.mrb[4].mxu1 %vm589_vm0, %v2633_v29  ;;  %2881 = vmatpush1.bf16.msra.mxu0 %v3650_v10  ;;  %v526_v29 = vld [vmem:[%s4520_s5 + $0x110] sm:$0xff]  ;;  %v3959_v38 = vpack.c.bf16 %v537_v33, %v533_v32  ;;  %v536_v41 = vld [vmem:[%s4520_s5 + $0x160] sm:$0xff]  ;;  %v541_v46 = vld [vmem:[%s4520_s5 + $0x188] sm:$0xff] }
  0x2c   : > { %2889 = vmatpush1.bf16.msra.mxu1 %v3662_v15  ;;  %837 = vmatprep.mubr.f32.mxu0 %v3533_v8  ;;  %v538_v45 = vld [vmem:[%s4520_s5 + $0x170] sm:$0xff]  ;;  %v543_v51 = vld [vmem:[%s4520_s5 + $0x198] sm:$0xff]  ;;  %v3989_v53 = vpack.c.bf16 %v536_v41, %v532_v39  ;;  %v540_v57 = vld [vmem:[%s4520_s5 + $0x180] sm:$0xff] }
  0x2d   : > { %914 = vmatprep.mubr.f32.mxu1 %v3533_v8  ;;  %2883 = vmatprep.subr.bf16.mxu0 %v3675_v19  ;;  %v547_v52 = vld [vmem:[%s4520_s5 + $0x1b8] sm:$0xff]  ;;  %v3993_v55 = vpack.c.bf16 %v538_v45, %v534_v42  ;;  %v544_v58 = vld [vmem:[%s4520_s5 + $0x1a0] sm:$0xff]  ;;  %v542_v59 = vld [vmem:[%s4520_s5 + $0x190] sm:$0xff] }
  0x2e   : > { %2891 = vmatprep.subr.bf16.mxu1 %v3677_v20  ;;  %2636 = vmatmul.mubr.msk.f32.gmra.mrb[6].mxu0 %vm589_vm0, %v2634_v30  ;;  %v555_v5 = vld [vmem:[%s4520_s5 + $0x1f8] sm:$0xff]  ;;  %v4025_v6 = vpack.c.bf16 %v544_v58, %v540_v57  ;;  %v550_v16 = vld [vmem:[%s4520_s5 + $0x1d0] sm:$0xff] }
  0x2f   : > { %2638 = vmatmul.mubr.msk.f32.gmra.mrb[6].mxu1 %vm589_vm0, %v2634_v30  ;;  %2885 = vmatpush1.bf16.msra.mxu0 %v3689_v24  ;;  %v3935_v30 = vpack.c.bf16 %v531_v22, %v527_v21  ;;  %v554_v18 = vld [vmem:[%s4520_s5 + $0x1f0] sm:$0xff]  ;;  %v4057_v21 = vld [vmem:[#allocation2] sm:$0xff]  ;;  %v4065_v22 = vld [vmem:[#allocation2 + $0x8] sm:$0xff] }
  0x30   : > { %2893 = vmatpush1.bf16.msra.mxu1 %v3696_v26  ;;  %1003 = vmatprep.mubr.f32.mxu0 %v3533_v8 }
  0x31   : > { %1080 = vmatprep.mubr.f32.mxu1 %v3533_v8  ;;  %2895 = vmatprep.subr.bf16.mxu0 %v3635_v4  ;;  %v514_v4 = vld [vmem:[%s4520_s5 + $0xb0] sm:$0xff] }
  0x32   : > { %2903 = vmatprep.subr.bf16.mxu1 %v3648_v9  ;;  %2641 = vmatmul.mubr.msk.f32.vlgmr.msra.gmra.mrb[8].mxu0 %vm589_vm0, %v2639_v31  ;;  %v523_v9 = vld [vmem:[%s4520_s5 + $0xf8] sm:$0xff]  ;;  %v3880_v12 = vpack.c.bf16 %v514_v4, %v510_v2  ;;  %v553_v2 = vld [vmem:[%s4520_s5 + $0x1e8] sm:$0xff] }
  0x33   : > { %2643 = vmatmul.mubr.msk.f32.vlgmr.msra.gmra.mrb[8].mxu1 %vm589_vm0, %v2639_v31  ;;  %2897 = vmatpush1.bf16.msra.mxu0 %v3650_v10  ;;  %v3872_v10 = vpack.c.bf16 %v512_v1, %v508_v0  ;;  %v3894_v17 = vpack.c.bf16 %v523_v9, %v519_v7  ;;  %v530_v31 = vld [vmem:[%s4520_s5 + $0x130] sm:$0xff]  ;;  %v549_v1 = vld [vmem:[%s4520_s5 + $0x1c8] sm:$0xff]  ;;  %v551_v4 = vld [vmem:[%s4520_s5 + $0x1d8] sm:$0xff] }
  0x34   : > { %2905 = vmatpush1.bf16.msra.mxu1 %v3662_v15  ;;  %1009 = vmatprep.mubr.f32.mxu0 %v3533_v8  ;;  %v520_v15 = vld [vmem:[%s4520_s5 + $0xe0] sm:$0xff]  ;;  %v3957_v37 = vpack.c.bf16 %v530_v31, %v526_v29  ;;  %v546_v0 = vld [vmem:[%s4520_s5 + $0x1b0] sm:$0xff]  ;;  %v4031_v9 = vpack.c.bf16 %v553_v2, %v549_v1 }
  0x35   : > { %1086 = vmatprep.mubr.f32.mxu1 %v3533_v8  ;;  %2899 = vmatprep.subr.bf16.mxu0 %v3675_v19  ;;  %v525_v19 = vld [vmem:[%s4520_s5 + $0x108] sm:$0xff]  ;;  %v3914_v23 = vpack.c.bf16 %v520_v15, %v516_v14  ;;  %v4029_v7 = vpack.c.bf16 %v546_v0, %v542_v59  ;;  %v552_v14 = vld [vmem:[%s4520_s5 + $0x1e0] sm:$0xff]  ;;  %v4040_v15 = vpack.c.bf16 %v555_v5, %v551_v4 }
  0x36   : > { %2907 = vmatprep.subr.bf16.mxu1 %v3677_v20  ;;  %2642 = vmatmul.mubr.msk.f32.gmra.mrb[10].mxu0 %vm589_vm0, %v2640_v34  ;;  %v529_v20 = vld [vmem:[%s4520_s5 + $0x128] sm:$0xff]  ;;  %v556_v29 = vld [vmem:[%s4519_s4] sm:$0xf] }
  0x37   : > { %2644 = vmatmul.mubr.msk.f32.gmra.mrb[10].mxu1 %vm589_vm0, %v2640_v34  ;;  %2901 = vmatpush1.bf16.msra.mxu0 %v3689_v24  ;;  %v579_v24 = vld [vmem:[%s4515_s0 + $0x8] sm:$0xff]  ;;  %v535_v34 = vld [vmem:[%s4520_s5 + $0x158] sm:$0xff] }
  0x38   : > { %2909 = vmatpush1.bf16.msra.mxu1 %v3696_v26  ;;  %1175 = vmatprep.mubr.f32.mxu0 %v3533_v8  ;;  %v3923_v26 = vpack.c.bf16 %v529_v20, %v525_v19  ;;  %v3971_v43 = vpack.c.bf16 %v539_v35, %v535_v34  ;;  %v4053_v20 = vpack.c.bf16 %v554_v18, %v550_v16 }
  0x39   : > { %1252 = vmatprep.mubr.f32.mxu1 %v3533_v8  ;;  %2911 = vmatprep.subr.bf16.mxu0 %v3768_v40 }
  0x3a   : > { %2943 = vmatprep.subr.bf16.mxu1 %v3781_v44  ;;  %2647 = vmatmul.mubr.msk.f32.vlgmr.msra.gmra.mrb[12].mxu0 %vm589_vm0, %v2645_v47 }
  0x3b   : > { %2649 = vmatmul.mubr.msk.f32.vlgmr.msra.gmra.mrb[12].mxu1 %vm589_vm0, %v2645_v47  ;;  %2913 = vmatpush1.bf16.msra.mxu0 %v3792_v48  ;;  %v545_v47 = vld [vmem:[%s4520_s5 + $0x1a8] sm:$0xff] }
  0x3c   : > { %2945 = vmatpush1.bf16.msra.mxu1 %v3796_v49  ;;  %2915 = vmatprep.subr.bf16.mxu0 %v3798_v50  ;;  %v3995_v56 = vpack.c.bf16 %v545_v47, %v541_v46 }
  0x3d   : > { %2947 = vmatprep.subr.bf16.mxu1 %v3811_v54  ;;  %1181 = vmatprep.mubr.f32.mxu0 %v3533_v8 }
  0x3e   : > { %1258 = vmatprep.mubr.f32.mxu1 %v3533_v8  ;;  %2648 = vmatmul.mubr.msk.f32.gmra.mrb[14].mxu0 %vm589_vm0, %v2646_v61 }
  0x3f   : > { %2917 = vmatpush1.bf16.msra.mxu0 %v3832_v60  ;;  %2650 = vmatmul.mubr.msk.f32.gmra.mrb[14].mxu1 %vm589_vm0, %v2646_v61  ;;  %v4007_v61 = vpack.c.bf16 %v547_v52, %v543_v51 }
  0x40   : > { %2949 = vmatpush1.bf16.msra.mxu1 %v3837_v62  ;;  %2919 = vmatprep.subr.bf16.mxu0 %v3839_v63 }
  0x41   : > { %2951 = vmatprep.subr.bf16.mxu1 %v3851_v3  ;;  %1350 = vmatprep.mubr.f32.mxu0 %v3533_v8 }
  0x42   : > { %1427 = vmatprep.mubr.f32.mxu1 %v3533_v8  ;;  %581 = vperm.xlu0 %3355, %v578_v11   ;;  %v548_v11 = vld [vmem:[%s4520_s5 + $0x1c0] sm:$0xff] }
  0x43   : > { %2921 = vmatpush1.bf16.msra.mxu0 %v3872_v10  ;;  %v4049_v19 = vpack.c.bf16 %v552_v14, %v548_v11 }
  0x44   : > { %2953 = vmatpush1.bf16.msra.mxu1 %v3880_v12  ;;  %2923 = vmatprep.subr.bf16.mxu0 %v3882_v13 }
  0x45   : > { %2955 = vmatprep.subr.bf16.mxu1 %v3894_v17 }
  0x46   : > { %584 = vperm.xlu0 %3355, %v579_v24   ;;  %v558_v24 = vlaneseq }
  0x47   : > { %2925 = vmatpush1.bf16.msra.mxu0 %v3914_v23 }
  0x48   : > { %2957 = vmatpush1.bf16.msra.mxu1 %v3921_v25  ;;  %2927 = vmatprep.subr.bf16.mxu0 %v3923_v26  ;;  %v559_v27 = vshrl.u32 %v558_v24, 7 }
  0x49   : > { %2959 = vmatprep.subr.bf16.mxu1 %v3935_v30 }
  0x4a   : > { %v560_v28 = vsub.s32 0, %v559_v27  ;;  %v564_v31 = vsub.s32 1, %v559_v27  ;;  %v572_v35 = vsub.s32 3, %v559_v27  ;;  %v568_v58 = vsub.s32 2, %v559_v27 }
  0x4b   : > { %2929 = vmatpush1.bf16.msra.mxu0 %v3953_v36 }
  0x4c   : > { %2961 = vmatpush1.bf16.msra.mxu1 %v3957_v37  ;;  %2931 = vmatprep.subr.bf16.mxu0 %v3959_v38  ;;  %v4107_v32 = vrot.slane %v556_v29, %v560_v28  ;;  %v4109_v33 = vrot.slane %v556_v29, %v564_v31  ;;  %v4113_v52 = vrot.slane %v556_v29, %v572_v35 }
  0x4d   : > { %2963 = vmatprep.subr.bf16.mxu1 %v3971_v43  ;;  %v4118_v16 = vrot.slane %v556_v29, %v568_v58  ;;  %v1276_v58 = vld [vmem:[#allocation3] sm:$0xff] }
  0x4f   : > { %2933 = vmatpush1.bf16.msra.mxu0 %v3989_v53 }
  0x50   : > { %2965 = vmatpush1.bf16.msra.mxu1 %v3993_v55  ;;  %2935 = vmatprep.subr.bf16.mxu0 %v3995_v56 }
  0x51   : > { %2967 = vmatprep.subr.bf16.mxu1 %v4007_v61 }
  0x53   : > { %2937 = vmatpush1.bf16.msra.mxu0 %v4025_v6 }
  0x54   : > { %2969 = vmatpush1.bf16.msra.mxu1 %v4029_v7  ;;  %2939 = vmatprep.subr.bf16.mxu0 %v4031_v9 }
  0x55   : > { %2971 = vmatprep.subr.bf16.mxu1 %v4040_v15 }
  0x57   : > { %2941 = vmatpush1.bf16.msra.mxu0 %v4049_v19 }
  0x58   : > { %2973 = vmatpush1.bf16.msra.mxu1 %v4053_v20  ;;  %2975 = vmatprep.subr.bf16.mxu0 %v3768_v40 }
  0x59   : > { %3007 = vmatprep.subr.bf16.mxu1 %v3781_v44 }
  0x5a   : > { %1351 = vmatmul.mubr.f32.vlgmr.msra.gmra.mrb[0].mxu0 %v4057_v21 }
  0x5b   : > { %1428 = vmatmul.mubr.f32.vlgmr.msra.gmra.mrb[0].mxu1 %v4057_v21  ;;  %1356 = vmatprep.mubr.f32.mxu0 %v3533_v8 }
  0x5c   : > { %1433 = vmatprep.mubr.f32.mxu1 %v3533_v8  ;;  %2977 = vmatpush1.bf16.msra.mxu0 %v3792_v48 }
  0x5d   : > { %3009 = vmatpush1.bf16.msra.mxu1 %v3796_v49  ;;  %2979 = vmatprep.subr.bf16.mxu0 %v3798_v50 }
  0x5e   : > { %1357 = vmatmul.mubr.f32.gmra.mrb[2].mxu0 %v4065_v22  ;;  %3011 = vmatprep.subr.bf16.mxu1 %v3811_v54 }
  0x5f   : > { %1434 = vmatmul.mubr.f32.gmra.mrb[2].mxu1 %v4065_v22  ;;  %1575 = vmatprep.mubr.f32.mxu0 %v3533_v8 }
  0x60   : > { %2981 = vmatpush1.bf16.msra.mxu0 %v3832_v60  ;;  %1652 = vmatprep.mubr.f32.mxu1 %v3533_v8 }
  0x61   : > { %3013 = vmatpush1.bf16.msra.mxu1 %v3837_v62  ;;  %2983 = vmatprep.subr.bf16.mxu0 %v3839_v63 }
  0x62   : > { %3015 = vmatprep.subr.bf16.mxu1 %v3851_v3 }
  0x64   : > { %2985 = vmatpush1.bf16.msra.mxu0 %v3872_v10 }
  0x65   : > { %3017 = vmatpush1.bf16.msra.mxu1 %v3880_v12  ;;  %2987 = vmatprep.subr.bf16.mxu0 %v3882_v13 }
  0x66   : > { %3019 = vmatprep.subr.bf16.mxu1 %v3894_v17 }
  0x68   : > { %2989 = vmatpush1.bf16.msra.mxu0 %v3914_v23 }
  0x69   : > { %3021 = vmatpush1.bf16.msra.mxu1 %v3921_v25  ;;  %2991 = vmatprep.subr.bf16.mxu0 %v3923_v26 }
  0x6a   : > { %3023 = vmatprep.subr.bf16.mxu1 %v3935_v30 }
  0x6c   : > { %2993 = vmatpush1.bf16.msra.mxu0 %v3953_v36 }
  0x6d   : > { %3025 = vmatpush1.bf16.msra.mxu1 %v3957_v37  ;;  %2995 = vmatprep.subr.bf16.mxu0 %v3959_v38 }
  0x6e   : > { %3027 = vmatprep.subr.bf16.mxu1 %v3971_v43 }
  0x70   : > { %2997 = vmatpush1.bf16.msra.mxu0 %v3989_v53 }
  0x71   : > { %3029 = vmatpush1.bf16.msra.mxu1 %v3993_v55  ;;  %2999 = vmatprep.subr.bf16.mxu0 %v3995_v56 }
  0x72   : > { %3031 = vmatprep.subr.bf16.mxu1 %v4007_v61 }
  0x74   : > { %3001 = vmatpush1.bf16.msra.mxu0 %v4025_v6 }
  0x75   : > { %3033 = vmatpush1.bf16.msra.mxu1 %v4029_v7  ;;  %3003 = vmatprep.subr.bf16.mxu0 %v4031_v9 }
  0x76   : > { %3035 = vmatprep.subr.bf16.mxu1 %v4040_v15 }
  0x78   : > { %3005 = vmatpush1.bf16.msra.mxu0 %v4049_v19 }
  0x79   : > { %3037 = vmatpush1.bf16.msra.mxu1 %v4053_v20  ;;  %3039 = vmatprep.subr.bf16.mxu0 %v3768_v40 }
  0x7a   : > { %3071 = vmatprep.subr.bf16.mxu1 %v3781_v44 }
 0x12d   : > { %v1352_v34 = vpop.f32.mrb[0].mxu0 }
 0x12e   : > { %v3262_v39 = vadd.f32 %v1352_v34, %v4107_v32  ;;  %v1429_v41 = vpop.f32.mrb[0].mxu1  ;;  %v1354_v42 = vpop.f32.mrb[1].mxu0 }
 0x12f   : > { %v3263_v45 = vadd.f32 %v1354_v42, %v4109_v33  ;;  %v1431_v46 = vpop.f32.mrb[1].mxu1  ;;  %v3266_v27 = vadd.f32 %v1429_v41, %v4118_v16 }
 0x130   : > { %v2651_v47 = vmul.f32 -1.442695, %v3262_v39  ;;  %v3267_v11 = vadd.f32 %v1431_v46, %v4113_v52 }
 0x131   : > { %v2653_v51 = vmul.f32 -1.442695, %v3263_v45  ;;  %v1358_v57 = vpop.f32.mrb[2].mxu0 }
 0x132   : > { %3356 = vpow2.f32 %v2651_v47  ;;  %v3264_v59 = vadd.f32 %v1358_v57, %v4107_v32  ;;  %v1435_v0 = vpop.f32.mrb[2].mxu1  ;;  %v1360_v1 = vpop.f32.mrb[3].mxu0  ;;  %v2655_v18 = vmul.f32 -1.442695, %v3267_v11 }
 0x133   : > { %3358 = vpow2.f32 %v2653_v51  ;;  %v3265_v2 = vadd.f32 %v1360_v1, %v4109_v33  ;;  %v1437_v4 = vpop.f32.mrb[3].mxu1  ;;  %v3268_v42 = vadd.f32 %v1435_v0, %v4118_v16  ;;  %v4123_v51 = vpop.permute.xlu0 %581  ;;  %v1496_v1 = vstv %s3616_s21 }
 0x134   : > { %v2652_v5 = vmul.f32 -1.442695, %v3264_v59  ;;  %v3269_v24 = vadd.f32 %v1437_v4, %v4113_v52  ;;  %vm4127_vm1 = vcmp.gt.s32.totalorder %v4123_v51, %v1496_v1 }
 0x135   : > { %v2654_v14 = vmul.f32 -1.442695, %v3265_v2 }
 0x136   : > { %3360 = vpow2.f32 %v2652_v5  ;;  %v2656_v35 = vmul.f32 -1.442695, %v3269_v24 }
 0x137   : > { %3362 = vpow2.f32 %v2654_v14 }
 0x138   : > { %3364 = vpow2.f32 %v2655_v18  ;;  %v1277_v18 = vld [vmem:[#allocation3 + $0x8] sm:$0xff] }
 0x139   : > { %3366 = vtanh.f32 %v3266_v27 }
 0x13c   : > { %v3357_v28 = vpop.eup %3356 }
 0x13d   : > { %v3359_v31 = vpop.eup %3358  ;;  %v1454_v34 = vadd.f32 1.0, %v3357_v28  ;;  %v4131_v28 = vpop.permute.xlu0 %584 }
 0x13e   : > { %v1466_v39 = vadd.f32 1.0, %v3359_v31  ;;  %vm4138_vm2 = vcmp.gt.s32.totalorder %v4131_v28, %v1496_v1 }
 0x13f   : > { %3368 = vrcp.f32 %v1454_v34 }
 0x140   : > { %v3361_v29 = vpop.eup %3360  ;;  %3370 = vrcp.f32 %v1466_v39 }
 0x141   : > { %v3363_v45 = vpop.eup %3362  ;;  %v1455_v46 = vadd.f32 1.0, %v3361_v29  ;;  %3372 = vpow2.f32 %v2656_v35 }
 0x142   : > { %3374 = vtanh.f32 %v3268_v42  ;;  %v1467_v47 = vadd.f32 1.0, %v3363_v45  ;;  %v3365_v41 = vpop.eup %3364 }
 0x143   : > { %3376 = vrcp.f32 %v1455_v46  ;;  %v3367_v57 = vpop.eup %3366  ;;  %v1480_v4 = vadd.f32 1.0, %v3365_v41 }
 0x144   : > { %3378 = vrcp.f32 %v1467_v47 }
 0x145   : > { %3380 = vrcp.f32 %v1480_v4 }
 0x149   : > { %v3369_v59 = vpop.eup %3368 }
 0x14a   : > { %v3371_v2 = vpop.eup %3370  ;;  %v1488_v0 = vmul.f32 %v3369_v59, %v3367_v57 }
 0x14b   : > { %v3373_v5 = vpop.eup %3372  ;;  %v1486_v11 = vmul.f32 %v3371_v2, %v1276_v58 }
 0x14c   : > { %v3375_v14 = vpop.eup %3374  ;;  %v1481_v39 = vadd.f32 1.0, %v3373_v5 }
 0x14d   : > { %v3377_v27 = vpop.eup %3376  ;;  %v1490_v31 = vadd.f32 %v1488_v0, %v1486_v11 }
 0x14e   : > { %v3379_v34 = vpop.eup %3378  ;;  %v1489_v35 = vmul.f32 %v3377_v27, %v3375_v14 }
 0x14f   : > { %v1487_v42 = vmul.f32 %v3379_v34, %v1277_v18  ;;  %3382 = vtanh.f32 %v1490_v31  ;;  %v4135_v29 = vsel %vm4127_vm1, %v1490_v31, %v1276_v58  ;;  %v3381_v41 = vpop.eup %3380 }
 0x150   : > { %3384 = vrcp.f32 %v1481_v39 }
 0x151   : > { %v1491_v46 = vadd.f32 %v1489_v35, %v1487_v42 }
 0x153   : > { %3386 = vtanh.f32 %v1491_v46  ;;  %v4144_v47 = vsel %vm4138_vm2, %v1491_v46, %v1277_v18 }
 0x159   : > { %v3383_v57 = vpop.eup %3382 }
 0x15a   : > { %v1494_v59 = vmul.f32 %v3383_v57, %v3381_v41  ;;  %v3385_v2 = vpop.eup %3384 }
 0x15c   : > { %v4149_v58 = vsel %vm4127_vm1, %v1494_v59, %v4057_v21 }
 0x15d   : > { %v3387_v1 = vpop.eup %3386  ;;  %1576 = vmatmul.mubr.f32.vlgmr.msra.gmra.mrb[4].mxu0 %v4149_v58  ;;  %1653 = vmatmul.mubr.f32.vlgmr.msra.gmra.mrb[4].mxu1 %v4149_v58 }
 0x15e   : > { %1581 = vmatprep.mubr.f32.mxu0 %v3533_v8  ;;  %1658 = vmatprep.mubr.f32.mxu1 %v3533_v8  ;;  %v1495_v0 = vmul.f32 %v3387_v1, %v3385_v2 }
 0x15f   : > { %3041 = vmatpush1.bf16.msra.mxu0 %v3792_v48  ;;  %3073 = vmatpush1.bf16.msra.mxu1 %v3796_v49 }
 0x160   : > { %v4160_v4 = vsel %vm4138_vm2, %v1495_v0, %v4065_v22  ;;  %3043 = vmatprep.subr.bf16.mxu0 %v3798_v50  ;;  %3075 = vmatprep.subr.bf16.mxu1 %v3811_v54 }
 0x161   : > { %1582 = vmatmul.mubr.f32.gmra.mrb[6].mxu0 %v4160_v4  ;;  %1659 = vmatmul.mubr.f32.gmra.mrb[6].mxu1 %v4160_v4 }
 0x162   : > { %1801 = vmatprep.mubr.f32.mxu0 %v3533_v8  ;;  %1878 = vmatprep.mubr.f32.mxu1 %v3533_v8 }
 0x163   : > { %3045 = vmatpush1.bf16.msra.mxu0 %v3832_v60  ;;  %3077 = vmatpush1.bf16.msra.mxu1 %v3837_v62 }
 0x164   : > { %3047 = vmatprep.subr.bf16.mxu0 %v3839_v63  ;;  %3079 = vmatprep.subr.bf16.mxu1 %v3851_v3 }
 0x167   : > { %3049 = vmatpush1.bf16.msra.mxu0 %v3872_v10  ;;  %3081 = vmatpush1.bf16.msra.mxu1 %v3880_v12 }
 0x168   : > { %3051 = vmatprep.subr.bf16.mxu0 %v3882_v13  ;;  %3083 = vmatprep.subr.bf16.mxu1 %v3894_v17 }
 0x16b   : > { %3053 = vmatpush1.bf16.msra.mxu0 %v3914_v23  ;;  %3085 = vmatpush1.bf16.msra.mxu1 %v3921_v25 }
 0x16c   : > { %3055 = vmatprep.subr.bf16.mxu0 %v3923_v26  ;;  %3087 = vmatprep.subr.bf16.mxu1 %v3935_v30 }
 0x16f   : > { %3057 = vmatpush1.bf16.msra.mxu0 %v3953_v36  ;;  %3089 = vmatpush1.bf16.msra.mxu1 %v3957_v37 }
 0x170   : > { %3059 = vmatprep.subr.bf16.mxu0 %v3959_v38  ;;  %3091 = vmatprep.subr.bf16.mxu1 %v3971_v43 }
 0x173   : > { %3061 = vmatpush1.bf16.msra.mxu0 %v3989_v53  ;;  %3093 = vmatpush1.bf16.msra.mxu1 %v3993_v55 }
 0x174   : > { %3063 = vmatprep.subr.bf16.mxu0 %v3995_v56  ;;  %3095 = vmatprep.subr.bf16.mxu1 %v4007_v61 }
 0x177   : > { %3065 = vmatpush1.bf16.msra.mxu0 %v4025_v6  ;;  %3097 = vmatpush1.bf16.msra.mxu1 %v4029_v7 }
 0x178   : > { %3067 = vmatprep.subr.bf16.mxu0 %v4031_v9  ;;  %3099 = vmatprep.subr.bf16.mxu1 %v4040_v15 }
 0x17b   : > { %3069 = vmatpush1.bf16.msra.mxu0 %v4049_v19  ;;  %3101 = vmatpush1.bf16.msra.mxu1 %v4053_v20 }
 0x17c   : > { %3103 = vmatprep.subr.bf16.mxu0 %v3768_v40  ;;  %3135 = vmatprep.subr.bf16.mxu1 %v3781_v44 }
 0x230   : > { %v1577_v21 = vpop.f32.mrb[4].mxu0  ;;  %v1654_v22 = vpop.f32.mrb[4].mxu1 }
 0x231   : > { %v3270_v5 = vadd.f32 %v1577_v21, %v4107_v32  ;;  %v1579_v11 = vpop.f32.mrb[5].mxu0  ;;  %v1656_v14 = vpop.f32.mrb[5].mxu1  ;;  %v3274_v59 = vadd.f32 %v1654_v22, %v4118_v16 }
 0x232   : > { %v3271_v18 = vadd.f32 %v1579_v11, %v4109_v33  ;;  %v3275_v45 = vadd.f32 %v1656_v14, %v4113_v52 }
 0x233   : > { %v2657_v24 = vmul.f32 -1.442695, %v3270_v5 }
 0x234   : > { %v2659_v27 = vmul.f32 -1.442695, %v3271_v18  ;;  %v1583_v31 = vpop.f32.mrb[6].mxu0  ;;  %v1660_v34 = vpop.f32.mrb[6].mxu1  ;;  %v2661_v41 = vmul.f32 -1.442695, %v3275_v45  ;;  %v1722_v45 = vstv %s1721_s30 }
 0x235   : > { %3388 = vpow2.f32 %v2657_v24  ;;  %v3272_v35 = vadd.f32 %v1583_v31, %v4107_v32  ;;  %v1585_v39 = vpop.f32.mrb[7].mxu0  ;;  %v1662_v42 = vpop.f32.mrb[7].mxu1  ;;  %v3276_v11 = vadd.f32 %v1660_v34, %v4118_v16  ;;  %vm1723_vm3 = vcmp.gt.s32.totalorder %v4123_v51, %v1722_v45 }
 0x236   : > { %3390 = vpow2.f32 %v2659_v27  ;;  %v3273_v40 = vadd.f32 %v1585_v39, %v4109_v33  ;;  %v3277_v57 = vadd.f32 %v1662_v42, %v4113_v52  ;;  %vm1724_vm4 = vcmp.gt.s32.totalorder %v4131_v28, %v1722_v45 }
 0x237   : > { %v2658_v44 = vmul.f32 -1.442695, %v3272_v35  ;;  %v1948_v45 = vstv %s1947_s12 }
 0x238   : > { %v2660_v46 = vmul.f32 -1.442695, %v3273_v40  ;;  %v2662_v21 = vmul.f32 -1.442695, %v3277_v57  ;;  %vm1949_vm5 = vcmp.gt.s32.totalorder %v4123_v51, %v1948_v45  ;;  %vm1950_vm6 = vcmp.gt.s32.totalorder %v4131_v28, %v1948_v45 }
 0x239   : > { %3392 = vpow2.f32 %v2658_v44 }
 0x23a   : > { %3394 = vpow2.f32 %v2660_v46 }
 0x23b   : > { %3396 = vpow2.f32 %v2661_v41 }
 0x23c   : > { %3398 = vtanh.f32 %v3274_v59 }
 0x23f   : > { %v3389_v2 = vpop.eup %3388 }
 0x240   : > { %v3391_v1 = vpop.eup %3390  ;;  %v1679_v0 = vadd.f32 1.0, %v3389_v2 }
 0x241   : > { %v1691_v5 = vadd.f32 1.0, %v3391_v1 }
 0x242   : > { %3400 = vrcp.f32 %v1679_v0 }
 0x243   : > { %v3393_v14 = vpop.eup %3392  ;;  %3402 = vrcp.f32 %v1691_v5 }
 0x244   : > { %v3395_v18 = vpop.eup %3394  ;;  %v1680_v24 = vadd.f32 1.0, %v3393_v14  ;;  %3404 = vpow2.f32 %v2662_v21 }
 0x245   : > { %3406 = vtanh.f32 %v3276_v11  ;;  %v1692_v27 = vadd.f32 1.0, %v3395_v18  ;;  %v3397_v22 = vpop.eup %3396 }
 0x246   : > { %3408 = vrcp.f32 %v1680_v24  ;;  %v3399_v31 = vpop.eup %3398  ;;  %v1705_v40 = vadd.f32 1.0, %v3397_v22 }
 0x247   : > { %3410 = vrcp.f32 %v1692_v27 }
 0x248   : > { %3412 = vrcp.f32 %v1705_v40 }
 0x24c   : > { %v3401_v35 = vpop.eup %3400 }
 0x24d   : > { %v3403_v39 = vpop.eup %3402  ;;  %v1713_v42 = vmul.f32 %v3401_v35, %v3399_v31 }
 0x24e   : > { %v3405_v44 = vpop.eup %3404  ;;  %v1711_v34 = vmul.f32 %v3403_v39, %v4135_v29 }
 0x24f   : > { %v3407_v46 = vpop.eup %3406  ;;  %v1706_v1 = vadd.f32 1.0, %v3405_v44 }
 0x250   : > { %v3409_v41 = vpop.eup %3408  ;;  %v1715_v57 = vadd.f32 %v1713_v42, %v1711_v34 }
 0x251   : > { %v3411_v59 = vpop.eup %3410  ;;  %v1714_v2 = vmul.f32 %v3409_v41, %v3407_v46 }
 0x252   : > { %3414 = vtanh.f32 %v1715_v57  ;;  %v1712_v0 = vmul.f32 %v3411_v59, %v4144_v47  ;;  %v4211_v21 = vsel %vm1723_vm3, %v1715_v57, %v4135_v29  ;;  %v3413_v14 = vpop.eup %3412 }
 0x253   : > { %3416 = vrcp.f32 %v1706_v1 }
 0x254   : > { %v1716_v5 = vadd.f32 %v1714_v2, %v1712_v0 }
 0x256   : > { %3418 = vtanh.f32 %v1716_v5  ;;  %v4217_v11 = vsel %vm1724_vm4, %v1716_v5, %v4144_v47 }
 0x25c   : > { %v3415_v18 = vpop.eup %3414 }
 0x25d   : > { %v1719_v24 = vmul.f32 %v3415_v18, %v3413_v14  ;;  %v3417_v27 = vpop.eup %3416 }
 0x25f   : > { %v4222_v22 = vsel %vm1723_vm3, %v1719_v24, %v4149_v58 }
 0x260   : > { %v3419_v29 = vpop.eup %3418  ;;  %1802 = vmatmul.mubr.f32.vlgmr.msra.gmra.mrb[8].mxu0 %v4222_v22  ;;  %1879 = vmatmul.mubr.f32.vlgmr.msra.gmra.mrb[8].mxu1 %v4222_v22 }
 0x261   : > { %1807 = vmatprep.mubr.f32.mxu0 %v3533_v8  ;;  %1884 = vmatprep.mubr.f32.mxu1 %v3533_v8  ;;  %v1720_v47 = vmul.f32 %v3419_v29, %v3417_v27 }
 0x262   : > { %3105 = vmatpush1.bf16.msra.mxu0 %v3792_v48  ;;  %3137 = vmatpush1.bf16.msra.mxu1 %v3796_v49 }
 0x263   : > { %v4233_v31 = vsel %vm1724_vm4, %v1720_v47, %v4160_v4  ;;  %3107 = vmatprep.subr.bf16.mxu0 %v3798_v50  ;;  %3139 = vmatprep.subr.bf16.mxu1 %v3811_v54 }
 0x264   : > { %1808 = vmatmul.mubr.f32.gmra.mrb[10].mxu0 %v4233_v31  ;;  %1885 = vmatmul.mubr.f32.gmra.mrb[10].mxu1 %v4233_v31 }
 0x265   : > { %2027 = vmatprep.mubr.f32.mxu0 %v3533_v8  ;;  %2104 = vmatprep.mubr.f32.mxu1 %v3533_v8 }
 0x266   : > { %3109 = vmatpush1.bf16.msra.mxu0 %v3832_v60  ;;  %3141 = vmatpush1.bf16.msra.mxu1 %v3837_v62 }
 0x267   : > { %3111 = vmatprep.subr.bf16.mxu0 %v3839_v63  ;;  %3143 = vmatprep.subr.bf16.mxu1 %v3851_v3 }
 0x26a   : > { %3113 = vmatpush1.bf16.msra.mxu0 %v3872_v10  ;;  %3145 = vmatpush1.bf16.msra.mxu1 %v3880_v12 }
 0x26b   : > { %3115 = vmatprep.subr.bf16.mxu0 %v3882_v13  ;;  %3147 = vmatprep.subr.bf16.mxu1 %v3894_v17 }
 0x26e   : > { %3117 = vmatpush1.bf16.msra.mxu0 %v3914_v23  ;;  %3149 = vmatpush1.bf16.msra.mxu1 %v3921_v25 }
 0x26f   : > { %3119 = vmatprep.subr.bf16.mxu0 %v3923_v26  ;;  %3151 = vmatprep.subr.bf16.mxu1 %v3935_v30 }
 0x272   : > { %3121 = vmatpush1.bf16.msra.mxu0 %v3953_v36  ;;  %3153 = vmatpush1.bf16.msra.mxu1 %v3957_v37 }
 0x273   : > { %3123 = vmatprep.subr.bf16.mxu0 %v3959_v38  ;;  %3155 = vmatprep.subr.bf16.mxu1 %v3971_v43 }
 0x276   : > { %3125 = vmatpush1.bf16.msra.mxu0 %v3989_v53  ;;  %3157 = vmatpush1.bf16.msra.mxu1 %v3993_v55 }
 0x277   : > { %3127 = vmatprep.subr.bf16.mxu0 %v3995_v56  ;;  %3159 = vmatprep.subr.bf16.mxu1 %v4007_v61 }
 0x27a   : > { %3129 = vmatpush1.bf16.msra.mxu0 %v4025_v6  ;;  %3161 = vmatpush1.bf16.msra.mxu1 %v4029_v7 }
 0x27b   : > { %3131 = vmatprep.subr.bf16.mxu0 %v4031_v9  ;;  %3163 = vmatprep.subr.bf16.mxu1 %v4040_v15 }
 0x27e   : > { %3133 = vmatpush1.bf16.msra.mxu0 %v4049_v19  ;;  %3165 = vmatpush1.bf16.msra.mxu1 %v4053_v20 }
 0x333   : > { %v1803_v48 = vpop.f32.mrb[8].mxu0  ;;  %v1880_v49 = vpop.f32.mrb[8].mxu1 }
 0x334   : > { %v3278_v50 = vadd.f32 %v1803_v48, %v4107_v32  ;;  %v1805_v54 = vpop.f32.mrb[9].mxu0  ;;  %v1882_v60 = vpop.f32.mrb[9].mxu1  ;;  %v3282_v43 = vadd.f32 %v1880_v49, %v4118_v16 }
 0x335   : > { %v3279_v62 = vadd.f32 %v1805_v54, %v4109_v33  ;;  %v3283_v30 = vadd.f32 %v1882_v60, %v4113_v52 }
 0x336   : > { %v2663_v63 = vmul.f32 -1.442695, %v3278_v50 }
 0x337   : > { %v2665_v3 = vmul.f32 -1.442695, %v3279_v62  ;;  %v1809_v10 = vpop.f32.mrb[10].mxu0  ;;  %v1886_v12 = vpop.f32.mrb[10].mxu1  ;;  %v2667_v37 = vmul.f32 -1.442695, %v3283_v30 }
 0x338   : > { %3420 = vpow2.f32 %v2663_v63  ;;  %v3280_v13 = vadd.f32 %v1809_v10, %v4107_v32  ;;  %v1811_v17 = vpop.f32.mrb[11].mxu0  ;;  %v1888_v23 = vpop.f32.mrb[11].mxu1  ;;  %v3284_v7 = vadd.f32 %v1886_v12, %v4118_v16 }
 0x339   : > { %3422 = vpow2.f32 %v2665_v3  ;;  %v3281_v25 = vadd.f32 %v1811_v17, %v4109_v33  ;;  %v3285_v38 = vadd.f32 %v1888_v23, %v4113_v52 }
 0x33a   : > { %v2664_v26 = vmul.f32 -1.442695, %v3280_v13 }
 0x33b   : > { %v2666_v36 = vmul.f32 -1.442695, %v3281_v25  ;;  %v2668_v61 = vmul.f32 -1.442695, %v3285_v38 }
 0x33c   : > { %3424 = vpow2.f32 %v2664_v26 }
 0x33d   : > { %3426 = vpow2.f32 %v2666_v36 }
 0x33e   : > { %3428 = vpow2.f32 %v2667_v37 }
 0x33f   : > { %3430 = vtanh.f32 %v3282_v43 }
 0x342   : > { %v3421_v53 = vpop.eup %3420 }
 0x343   : > { %v3423_v55 = vpop.eup %3422  ;;  %v1905_v56 = vadd.f32 1.0, %v3421_v53 }
 0x344   : > { %v1917_v6 = vadd.f32 1.0, %v3423_v55 }
 0x345   : > { %3432 = vrcp.f32 %v1905_v56 }
 0x346   : > { %v3425_v9 = vpop.eup %3424  ;;  %3434 = vrcp.f32 %v1917_v6 }
 0x347   : > { %v3427_v15 = vpop.eup %3426  ;;  %v1906_v19 = vadd.f32 1.0, %v3425_v9  ;;  %3436 = vpow2.f32 %v2668_v61 }
 0x348   : > { %3438 = vtanh.f32 %v3284_v7  ;;  %v1918_v20 = vadd.f32 1.0, %v3427_v15  ;;  %v3429_v58 = vpop.eup %3428 }
 0x349   : > { %3440 = vrcp.f32 %v1906_v19  ;;  %v3431_v4 = vpop.eup %3430  ;;  %v1931_v40 = vadd.f32 1.0, %v3429_v58 }
 0x34a   : > { %3442 = vrcp.f32 %v1918_v20 }
 0x34b   : > { %3444 = vrcp.f32 %v1931_v40 }
 0x34f   : > { %v3433_v35 = vpop.eup %3432 }
 0x350   : > { %v3435_v39 = vpop.eup %3434  ;;  %v1939_v42 = vmul.f32 %v3433_v35, %v3431_v4 }
 0x351   : > { %v3437_v44 = vpop.eup %3436  ;;  %v1937_v34 = vmul.f32 %v3435_v39, %v4211_v21  ;;  %v2174_v39 = vstv %s2173_s13 }
 0x352   : > { %v3439_v46 = vpop.eup %3438  ;;  %v1932_v1 = vadd.f32 1.0, %v3437_v44  ;;  %vm2175_vm7 = vcmp.gt.s32.totalorder %v4123_v51, %v2174_v39  ;;  %vm2176_vm8 = vcmp.gt.s32.totalorder %v4131_v28, %v2174_v39  ;;  %v2244_v51 = vld [vmem:[%s4522_s7 + $0x8] sm:$0xff] (!%p2675_p6) }
 0x353   : > { %v3441_v41 = vpop.eup %3440  ;;  %v1941_v57 = vadd.f32 %v1939_v42, %v1937_v34 }
 0x354   : > { %v3443_v59 = vpop.eup %3442  ;;  %v1940_v2 = vmul.f32 %v3441_v41, %v3439_v46 }
 0x355   : > { %3446 = vtanh.f32 %v1941_v57  ;;  %v1938_v0 = vmul.f32 %v3443_v59, %v4217_v11  ;;  %v4282_v5 = vsel %vm1949_vm5, %v1941_v57, %v4211_v21  ;;  %v3445_v24 = vpop.eup %3444 }
 0x356   : > { %3448 = vrcp.f32 %v1932_v1 }
 0x357   : > { %v1942_v14 = vadd.f32 %v1940_v2, %v1938_v0 }
 0x359   : > { %3450 = vtanh.f32 %v1942_v14  ;;  %v4286_v18 = vsel %vm1950_vm6, %v1942_v14, %v4217_v11 }
 0x35f   : > { %v3447_v27 = vpop.eup %3446 }
 0x360   : > { %v1945_v29 = vmul.f32 %v3447_v27, %v3445_v24  ;;  %v3449_v47 = vpop.eup %3448 }
 0x362   : > { %v4291_v48 = vsel %vm1949_vm5, %v1945_v29, %v4222_v22 }
 0x363   : > { %v3451_v49 = vpop.eup %3450  ;;  %2028 = vmatmul.mubr.f32.vlgmr.msra.gmra.mrb[12].mxu0 %v4291_v48  ;;  %2105 = vmatmul.mubr.f32.vlgmr.msra.gmra.mrb[12].mxu1 %v4291_v48 }
 0x364   : > { %2033 = vmatprep.mubr.f32.mxu0 %v3533_v8  ;;  %2110 = vmatprep.mubr.f32.mxu1 %v3533_v8  ;;  %v1946_v21 = vmul.f32 %v3451_v49, %v3449_v47  ;;  %v2245_v47 = vld [vmem:[%s4522_s7 + $0x10] sm:$0xff] (!%p2675_p6)  ;;  %v2246_v49 = vld [vmem:[%s4522_s7 + $0x18] sm:$0xff] (!%p2675_p6) }
 0x366   : > { %v4298_v11 = vsel %vm1950_vm6, %v1946_v21, %v4233_v31  ;;  %v3170_v21 = vpack.c.bf16 (!%p2675_p6), %v2246_v49, %v2245_v47  ;;  %v2432_v49 = vld [vmem:[%s4524_s9 + $0x60] sm:$0xff] (!%p2675_p6) }
 0x367   : > { %2034 = vmatmul.mubr.f32.gmra.mrb[14].mxu0 %v4298_v11  ;;  %2111 = vmatmul.mubr.f32.gmra.mrb[14].mxu1 %v4298_v11 }
 0x436   : > { %v2029_v50 = vpop.f32.mrb[12].mxu0  ;;  %v2106_v22 = vpop.f32.mrb[12].mxu1 }
 0x437   : > { %v3286_v54 = vadd.f32 %v2029_v50, %v4107_v32  ;;  %v2031_v60 = vpop.f32.mrb[13].mxu0  ;;  %v2108_v62 = vpop.f32.mrb[13].mxu1  ;;  %v3290_v38 = vadd.f32 %v2106_v22, %v4118_v16  ;;  %v2248_v50 = vld [vmem:[%s4522_s7 + $0x28] sm:$0xff] (!%p2675_p6) }
 0x438   : > { %v3287_v63 = vadd.f32 %v2031_v60, %v4109_v33  ;;  %v3291_v26 = vadd.f32 %v2108_v62, %v4113_v52  ;;  %v2249_v60 = vld [vmem:[%s4522_s7 + $0x30] sm:$0xff] (!%p2675_p6)  ;;  %v2250_v62 = vld [vmem:[%s4522_s7 + $0x38] sm:$0xff] (!%p2675_p6) }
 0x439   : > { %v2669_v3 = vmul.f32 -1.442695, %v3286_v54  ;;  %v2189_v54 = vld [vmem:[%s4517_s2] sm:$0xff] (!%p2675_p6) }
 0x43a   : > { %v2671_v10 = vmul.f32 -1.442695, %v3287_v63  ;;  %v2035_v12 = vpop.f32.mrb[14].mxu0  ;;  %v2112_v8 = vpop.f32.mrb[14].mxu1  ;;  %v2673_v36 = vmul.f32 -1.442695, %v3291_v26 }
 0x43b   : > { %3452 = vpow2.f32 %v2669_v3  ;;  %v3288_v31 = vadd.f32 %v2035_v12, %v4107_v32  ;;  %v2037_v13 = vpop.f32.mrb[15].mxu0  ;;  %v2114_v17 = vpop.f32.mrb[15].mxu1  ;;  %v2676_v63 = vmul.f32 (!%p2675_p6), -1.442695, %v2189_v54  ;;  %v2192_v3 = vld [vmem:[%s4517_s2 + $0x20] sm:$0xff] (!%p2675_p6) }
 0x43c   : > { %3454 = vpow2.f32 %v2671_v10  ;;  %v3289_v23 = vadd.f32 %v2037_v13, %v4109_v33  ;;  %v3293_v37 = vadd.f32 %v2114_v17, %v4113_v52  ;;  %v3292_v33 = vadd.f32 %v2112_v8, %v4118_v16  ;;  %v2191_v10 = vld [vmem:[%s4517_s2 + $0x18] sm:$0xff] (!%p2675_p6)  ;;  %v2251_v13 = vld [vmem:[%s4522_s7 + $0x40] sm:$0xff] (!%p2675_p6)  ;;  %v2252_v17 = vld [vmem:[%s4522_s7 + $0x48] sm:$0xff] (!%p2675_p6) }
 0x43d   : > { %v2670_v25 = vmul.f32 -1.442695, %v3288_v31  ;;  %v2677_v12 = vmul.f32 (!%p2675_p6), -1.442695, %v2192_v3  ;;  %v3178_v8 = vpack.c.bf16 (!%p2675_p6), %v2250_v62, %v2249_v60  ;;  %v2194_v31 = vld [vmem:[%s4517_s2 + $0x38] sm:$0xff] (!%p2675_p6)  ;;  %v3182_v26 = vpack.c.bf16 (!%p2675_p6), %v2252_v17, %v2251_v13  ;;  %v2229_v3 = vld [vmem:[%s4521_s6 + $0x10] sm:$0xff] (!%p2675_p6) }
 0x43e   : > { %v2672_v30 = vmul.f32 -1.442695, %v3289_v23  ;;  %v2674_v32 = vmul.f32 -1.442695, %v3293_v37  ;;  %v2678_v23 = vmul.f32 (!%p2675_p6), -1.442695, %v2191_v10 }
 0x43f   : > { %3456 = vpow2.f32 %v2670_v25  ;;  %v2679_v25 = vmul.f32 (!%p2675_p6), -1.442695, %v2194_v31  ;;  %v2422_v37 = vld [vmem:[%s4524_s9 + $0x10] sm:$0xff] (!%p2675_p6)  ;;  %v2230_v10 = vld [vmem:[%s4521_s6 + $0x18] sm:$0xff] (!%p2675_p6)  ;;  %v2231_v17 = vld [vmem:[%s4521_s6 + $0x20] sm:$0xff] (!%p2675_p6) }
 0x440   : > { %3458 = vpow2.f32 %v2672_v30  ;;  %v2420_v30 = vld [vmem:[%s4524_s9] sm:$0xff] (!%p2675_p6)  ;;  %v3202_v13 = vpack.c.bf16 (!%p2675_p6), %v2230_v10, %v2229_v3 }
 0x441   : > { %3460 = vpow2.f32 %v2673_v36  ;;  %v2421_v36 = vld [vmem:[%s4524_s9 + $0x8] sm:$0xff] (!%p2675_p6) }
 0x442   : > { %3462 = vtanh.f32 %v3290_v38  ;;  %v2253_v38 = vld [vmem:[%s4522_s7 + $0x50] sm:$0xff] (!%p2675_p6) }
 0x445   : > { %v3453_v43 = vpop.eup %3452 }
 0x446   : > { %v3455_v53 = vpop.eup %3454  ;;  %v2131_v55 = vadd.f32 1.0, %v3453_v43  ;;  %v2254_v43 = vld [vmem:[%s4522_s7 + $0x58] sm:$0xff] (!%p2675_p6) }
 0x447   : > { %v2143_v56 = vadd.f32 1.0, %v3455_v53  ;;  %v3230_v53 = vpack.c.bf16 (!%p2675_p6), %v2421_v36, %v2420_v30  ;;  %v2234_v30 = vld [vmem:[%s4521_s6 + $0x38] sm:$0xff] (!%p2675_p6) }
 0x448   : > { %3464 = vrcp.f32 %v2131_v55  ;;  %v2423_v55 = vld [vmem:[%s4524_s9 + $0x18] sm:$0xff] (!%p2675_p6) }
 0x449   : > { %v3457_v61 = vpop.eup %3456  ;;  %3466 = vrcp.f32 %v2143_v56  ;;  %v2424_v56 = vld [vmem:[%s4524_s9 + $0x20] sm:$0xff] (!%p2675_p6)  ;;  %3231 = vmatprep.subr.bf16.mxu1 (!%p2675_p6), %v3230_v53 }
 0x44a   : > { %v3459_v6 = vpop.eup %3458  ;;  %v2132_v7 = vadd.f32 1.0, %v3457_v61  ;;  %3468 = vpow2.f32 %v2674_v32  ;;  %v3234_v32 = vpack.c.bf16 (!%p2675_p6), %v2423_v55, %v2422_v37  ;;  %v2190_v61 = vld [vmem:[%s4517_s2 + $0x10] sm:$0xff] (!%p2675_p6)  ;;  %3233 = vmatpush3.bf16.msra.mxu1 (!%p2675_p6), %v3230_v53  ;;  %v2235_v37 = vld [vmem:[%s4521_s6 + $0x40] sm:$0xff] (!%p2675_p6)  ;;  %v2238_v53 = vld [vmem:[%s4521_s6 + $0x58] sm:$0xff] (!%p2675_p6) }
 0x44b   : > { %3470 = vtanh.f32 %v3292_v33  ;;  %v2144_v52 = vadd.f32 1.0, %v3459_v6  ;;  %v3461_v9 = vpop.eup %3460  ;;  %v2425_v33 = vld [vmem:[%s4524_s9 + $0x28] sm:$0xff] (!%p2675_p6)  ;;  %v3186_v6 = vpack.c.bf16 (!%p2675_p6), %v2254_v43, %v2253_v38  ;;  %v2237_v43 = vld [vmem:[%s4521_s6 + $0x50] sm:$0xff] (!%p2675_p6) }
 0x44c   : > { %3472 = vrcp.f32 %v2132_v7  ;;  %v3463_v15 = vpop.eup %3462  ;;  %v2157_v4 = vadd.f32 1.0, %v3461_v9  ;;  %v2193_v7 = vld [vmem:[%s4517_s2 + $0x30] sm:$0xff] (!%p2675_p6)  ;;  %v2255_v9 = vld [vmem:[%s4522_s7 + $0x60] sm:$0xff] (!%p2675_p6)  ;;  %3235 = vmatprep.subr.bf16.mxu1 (!%p2675_p6), %v3234_v32  ;;  %v3218_v55 = vpack.c.bf16 (!%p2675_p6), %v2238_v53, %v2237_v43 }
 0x44d   : > { %3474 = vrcp.f32 %v2144_v52 }
 0x44e   : > { %3476 = vrcp.f32 %v2157_v4  ;;  %v2427_v4 = vld [vmem:[%s4524_s9 + $0x38] sm:$0xff] (!%p2675_p6)  ;;  %3237 = vmatpush3.bf16.msra.mxu1 (!%p2675_p6), %v3234_v32  ;;  %v2239_v32 = vld [vmem:[%s4521_s6 + $0x60] sm:$0xff] (!%p2675_p6) }
 0x452   : > { %v3465_v19 = vpop.eup %3464 }
 0x453   : > { %v3467_v20 = vpop.eup %3466  ;;  %v2165_v58 = vmul.f32 %v3465_v19, %v3463_v15  ;;  %v2256_v15 = vld [vmem:[%s4522_s7 + $0x68] sm:$0xff] (!%p2675_p6)  ;;  %v3238_v19 = vpack.c.bf16 (!%p2675_p6), %v2425_v33, %v2424_v56 }
 0x454   : > { %v3469_v35 = vpop.eup %3468  ;;  %v2163_v16 = vmul.f32 %v3467_v20, %v4282_v5  ;;  %v3190_v39 = vpack.c.bf16 (!%p2675_p6), %v2256_v15, %v2255_v9  ;;  %v2240_v56 = vld [vmem:[%s4521_s6 + $0x68] sm:$0xff] (!%p2675_p6)  ;;  %v2435_v9 = vld [vmem:[%s4524_s9 + $0x78] sm:$0xff] (!%p2675_p6) }
 0x455   : > { %v3471_v42 = vpop.eup %3470  ;;  %v2158_v46 = vadd.f32 1.0, %v3469_v35  ;;  %3239 = vmatprep.subr.bf16.mxu1 (!%p2675_p6), %v3238_v19  ;;  %v3222_v33 = vpack.c.bf16 (!%p2675_p6), %v2240_v56, %v2239_v32 }
 0x456   : > { %v3473_v40 = vpop.eup %3472  ;;  %v2167_v44 = vadd.f32 %v2165_v58, %v2163_v16  ;;  %v2426_v58 = vld [vmem:[%s4524_s9 + $0x30] sm:$0xff] (!%p2675_p6)  ;;  %3241 = vmatpush3.bf16.msra.mxu1 (!%p2675_p6), %v3238_v19  ;;  %v2680_v19 = vld [vmem:[%s4523_s8] ss:$0 sm:$0xff] (!%p2675_p6) }
 0x457   : > { %v3475_v45 = vpop.eup %3474  ;;  %v2166_v34 = vmul.f32 %v3473_v40, %v3471_v42  ;;  %v2257_v42 = vld [vmem:[%s4522_s7 + $0x70] sm:$0xff] (!%p2675_p6)  ;;  %v2258_v40 = vld [vmem:[%s4522_s7 + $0x78] sm:$0xff] (!%p2675_p6) }
 0x458   : > { %3478 = vtanh.f32 %v2167_v44  ;;  %v2179_v41 = vsel %vm2175_vm7, %v2167_v44, %v4282_v5  ;;  %v2164_v57 = vmul.f32 %v3475_v45, %v4286_v18  ;;  %v3477_v1 = vpop.eup %3476  ;;  %v3242_v44 = vpack.c.bf16 (!%p2675_p6), %v2427_v4, %v2426_v58  ;;  %v2428_v45 = vld [vmem:[%s4524_s9 + $0x40] sm:$0xff] (!%p2675_p6) }
 0x459   : > { %2183 = vst [vmem:[#allocation3] sm:$0xff] %v2179_v41  ;;  %3480 = vrcp.f32 %v2158_v46  ;;  %v3194_v41 = vpack.c.bf16 (!%p2675_p6), %v2258_v40, %v2257_v42 }
 0x45a   : > { %v2168_v59 = vadd.f32 %v2166_v34, %v2164_v57  ;;  %v2429_v34 = vld [vmem:[%s4524_s9 + $0x48] sm:$0xff] (!%p2675_p6)  ;;  %3243 = vmatprep.subr.bf16.mxu1 (!%p2675_p6), %v3242_v44 }
 0x45b   : > { %3245 = vmatpush3.bf16.msra.mxu1 (!%p2675_p6), %v3242_v44 }
 0x45c   : > { %3482 = vtanh.f32 %v2168_v59  ;;  %v2180_v2 = vsel %vm2176_vm8, %v2168_v59, %v4286_v18  ;;  %v2243_v18 = vld [vmem:[%s4522_s7] sm:$0xff] (!%p2675_p6) }
 0x45d   : > { %2184 = vst [vmem:[#allocation3 + $0x8] sm:$0xff] %v2180_v2  ;;  %3484 = vpow2.f32 (!%p2675_p6), %v2676_v63  ;;  %v2227_v59 = vld [vmem:[%s4521_s6] sm:$0xff] (!%p2675_p6)  ;;  %v2228_v2 = vld [vmem:[%s4521_s6 + $0x8] sm:$0xff] (!%p2675_p6) }
 0x45e   : > { %3486 = vpow2.f32 (!%p2675_p6), %v2677_v12 }
 0x45f   : > { %3488 = vpow2.f32 (!%p2675_p6), %v2678_v23  ;;  %v2232_v23 = vld [vmem:[%s4521_s6 + $0x28] sm:$0xff] (!%p2675_p6) }
 0x460   : > { %3490 = vpow2.f32 (!%p2675_p6), %v2679_v25  ;;  %v3206_v25 = vpack.c.bf16 (!%p2675_p6), %v2232_v23, %v2231_v17 }
 0x461   : > { %3492 = vtanh.f32 (!%p2675_p6), %v2190_v61  ;;  %v2241_v61 = vld [vmem:[%s4521_s6 + $0x70] sm:$0xff] (!%p2675_p6) }
 0x462   : > { %v3479_v0 = vpop.eup %3478  ;;  %3494 = vtanh.f32 (!%p2675_p6), %v2193_v7 }
 0x463   : > { %v2171_v14 = vmul.f32 %v3479_v0, %v3477_v1  ;;  %v3481_v24 = vpop.eup %3480  ;;  %v3246_v1 = vpack.c.bf16 (!%p2675_p6), %v2429_v34, %v2428_v45  ;;  %v2430_v0 = vld [vmem:[%s4524_s9 + $0x50] sm:$0xff] (!%p2675_p6) }
 0x464   : > { %2188 = sbr.rel (%p2675_p6) target bundleno = 1625 (0x659), region = 72 }
 0x465   : > { %v4322_v27 = vsel %vm2175_vm7, %v2171_v14, %v4291_v48  ;;  %v3166_v48 = vpack.c.bf16 (!%p2675_p6), %v2244_v51, %v2243_v18  ;;  %v2431_v14 = vld [vmem:[%s4524_s9 + $0x58] sm:$0xff] (!%p2675_p6)  ;;  %3247 = vmatprep.subr.bf16.mxu1 (!%p2675_p6), %v3246_v1 }
 0x466   : > { %v3483_v5 = vpop.eup %3482  ;;  %2181 = vst [vmem:[#allocation2] sm:$0xff] %v4322_v27  ;;  %v3250_v47 = vpack.c.bf16 (!%p2675_p6), %v2431_v14, %v2430_v0  ;;  %3249 = vmatpush3.bf16.msra.mxu1 (!%p2675_p6), %v3246_v1 }
 0x467   : > { %v2172_v29 = vmul.f32 %v3483_v5, %v3481_v24  ;;  %3167 = vmatprep.subr.bf16.mxu0 (!%p2675_p6), %v3166_v48  ;;  %v3485_v52 = vpop.eup (!%p2675_p6), %3484 }
 0x468   : > { %3169 = vmatpush3.bf16.msra.mxu0 (!%p2675_p6), %v3166_v48  ;;  %v2201_v20 = vadd.f32 (!%p2675_p6), 1.0, %v3485_v52  ;;  %v3487_v35 = vpop.eup (!%p2675_p6), %3486  ;;  %3251 = vmatprep.subr.bf16.mxu1 (!%p2675_p6), %v3250_v47  ;;  %v2434_v52 = vld [vmem:[%s4524_s9 + $0x70] sm:$0xff] (!%p2675_p6) }
 0x469   : > { %v4326_v28 = vsel %vm2176_vm8, %v2172_v29, %v4298_v11  ;;  %v2247_v11 = vld [vmem:[%s4522_s7 + $0x20] sm:$0xff] (!%p2675_p6)  ;;  %3171 = vmatprep.subr.bf16.mxu0 (!%p2675_p6), %v3170_v21  ;;  %v2202_v16 = vadd.f32 (!%p2675_p6), 1.0, %v3487_v35  ;;  %v3489_v46 = vpop.eup (!%p2675_p6), %3488  ;;  %v3198_v29 = vpack.c.bf16 (!%p2675_p6), %v2228_v2, %v2227_v59  ;;  %v3258_v15 = vpack.c.bf16 (!%p2675_p6), %v2435_v9, %v2434_v52 }
 0x46a   : > { %2182 = vst [vmem:[#allocation2 + $0x8] sm:$0xff] %v4326_v28  ;;  %v3174_v22 = vpack.c.bf16 (!%p2675_p6), %v2248_v50, %v2247_v11  ;;  %3496 = vrcp.f32 (!%p2675_p6), %v2201_v20  ;;  %v3491_v57 = vpop.eup (!%p2675_p6), %3490  ;;  %v2215_v24 = vadd.f32 (!%p2675_p6), 1.0, %v3489_v46  ;;  %3253 = vmatpush3.bf16.msra.mxu1 (!%p2675_p6), %v3250_v47 }
 0x46b   : > { %3498 = vrcp.f32 %v2202_v16  ;;  %v3493_v5 = vpop.eup %3492  ;;  %v2216_v18 = vadd.f32 1.0, %v3491_v57  ;;  %v2681_v16 = vld [vmem:[%s4525_s10] ss:$0 sm:$0xff] }
 0x46c   : > { %3173 = vmatpush3.bf16.msra.mxu0 %v3170_v21  ;;  %v3495_v51 = vpop.eup %3494  ;;  %v2433_v21 = vld [vmem:[%s4524_s9 + $0x68] sm:$0xff]  ;;  %3500 = vrcp.f32 %v2215_v24 }
 0x46d   : > { %3175 = vmatprep.subr.bf16.mxu0 %v3174_v22  ;;  %3502 = vrcp.f32 %v2216_v18  ;;  %v3254_v54 = vpack.c.bf16 %v2433_v21, %v2432_v49 }
 0x46f   : > { %3255 = vmatprep.subr.bf16.mxu1 %v3254_v54 }
 0x470   : > { %3177 = vmatpush3.bf16.msra.mxu0 %v3174_v22  ;;  %3257 = vmatpush3.bf16.msra.mxu1 %v3254_v54 }
 0x471   : > { %3179 = vmatprep.subr.bf16.mxu0 %v3178_v8  ;;  %3259 = vmatprep.subr.bf16.mxu1 %v3258_v15 }
 0x474   : > { %3181 = vmatpush3.bf16.msra.mxu0 %v3178_v8  ;;  %v3497_v48 = vpop.eup %3496  ;;  %3261 = vmatpush3.bf16.msra.mxu1 %v3258_v15 }
 0x475   : > { %3183 = vmatprep.subr.bf16.mxu0 %v3182_v26  ;;  %v2221_v11 = vmul.f32 %v3497_v48, %v3493_v5  ;;  %v3499_v50 = vpop.eup %3498 }
 0x476   : > { %v2222_v22 = vmul.f32 %v3499_v50, %v3495_v51  ;;  %v3501_v60 = vpop.eup %3500 }
 0x477   : > { %3504 = vtanh.f32 %v2221_v11  ;;  %v3503_v62 = vpop.eup %3502 }
 0x478   : > { %3185 = vmatpush3.bf16.msra.mxu0 %v3182_v26  ;;  %3506 = vtanh.f32 %v2222_v22  ;;  %v2233_v26 = vld [vmem:[%s4521_s6 + $0x30] sm:$0xff] }
 0x479   : > { %3187 = vmatprep.subr.bf16.mxu0 %v3186_v6  ;;  %v3210_v36 = vpack.c.bf16 %v2234_v30, %v2233_v26 }
 0x47c   : > { %3189 = vmatpush3.bf16.msra.mxu0 %v3186_v6  ;;  %v2242_v6 = vld [vmem:[%s4521_s6 + $0x78] sm:$0xff] }
 0x47d   : > { %3191 = vmatprep.subr.bf16.mxu0 %v3190_v39  ;;  %v3226_v7 = vpack.c.bf16 %v2242_v6, %v2241_v61 }
 0x480   : > { %3193 = vmatpush3.bf16.msra.mxu0 %v3190_v39 }
 0x481   : > { %3195 = vmatprep.subr.bf16.mxu0 %v3194_v41  ;;  %v3505_v63 = vpop.eup %3504 }
 0x482   : > { %v2225_v12 = vmul.f32 %v3505_v63, %v3501_v60  ;;  %v3507_v8 = vpop.eup %3506 }
 0x483   : > { %v2226_v31 = vmul.f32 %v3507_v8, %v3503_v62 }
 0x484   : > { %3197 = vmatpush3.bf16.msra.mxu0 %v3194_v41  ;;  %2773 = vmatprep.mubr.f32.mxu0 %v2225_v12 }
 0x485   : > { %3199 = vmatprep.subr.bf16.mxu0 %v3198_v29 }
 0x487   : > { %2774 = vmatmul.mubr.f32.vlgmr.msra.gmra.mrb[0].mxu0 %v2226_v31 }
 0x488   : > { %3201 = vmatpush3.bf16.msra.mxu0 %v3198_v29  ;;  %2808 = vmatprep.mubr.f32.mxu0 %v4322_v27  ;;  %v2236_v27 = vld [vmem:[%s4521_s6 + $0x48] sm:$0xff] }
 0x489   : > { %3203 = vmatprep.subr.bf16.mxu0 %v3202_v13  ;;  %v3214_v38 = vpack.c.bf16 %v2236_v27, %v2235_v37 }
 0x48c   : > { %3205 = vmatpush3.bf16.msra.mxu0 %v3202_v13 }
 0x48d   : > { %3207 = vmatprep.subr.bf16.mxu0 %v3206_v25 }
 0x490   : > { %3209 = vmatpush3.bf16.msra.mxu0 %v3206_v25 }
 0x491   : > { %3211 = vmatprep.subr.bf16.mxu0 %v3210_v36 }
 0x494   : > { %3213 = vmatpush3.bf16.msra.mxu0 %v3210_v36 }
 0x495   : > { %3215 = vmatprep.subr.bf16.mxu0 %v3214_v38 }
 0x498   : > { %3217 = vmatpush3.bf16.msra.mxu0 %v3214_v38 }
 0x499   : > { %3219 = vmatprep.subr.bf16.mxu0 %v3218_v55 }
 0x49c   : > { %3221 = vmatpush3.bf16.msra.mxu0 %v3218_v55 }
 0x49d   : > { %3223 = vmatprep.subr.bf16.mxu0 %v3222_v33 }
 0x4a0   : > { %3225 = vmatpush3.bf16.msra.mxu0 %v3222_v33 }
 0x4a1   : > { %3227 = vmatprep.subr.bf16.mxu0 %v3226_v7 }
 0x4a4   : > { %3229 = vmatpush3.bf16.msra.mxu0 %v3226_v7 }
 0x4a7   : > { %2809 = vmatmul.mubr.f32.vlgmr.msra.gmra.mrb[0].mxu0 %v4326_v28 }
 0x57a   : > { %v2810_v20 = vpop.f32.mrb[0].mxu0 }
 0x57b   : > { %v2417_v58 = vadd.f32 %v2810_v20, %v2680_v19  ;;  %v2400_v4 = vpop.f32.mrb[1].mxu0 }
 0x57c   : > { %v2416_v35 = vadd.f32 %v2680_v19, %v2400_v4 }
 0x57d   : > { %v2419_v39 = vmax.f32 %v2417_v58, 0.0 }
 0x57e   : > { %v2418_v28 = vmax.f32 %v2416_v35, 0.0 }
 0x580   : > { %2843 = vmatprep.mubr.f32.mxu1 %v2418_v28 }
 0x581   : > { %2844 = vmatmul.mubr.f32.vlgmr.msra.gmra.mrb[0].mxu1 %v2419_v39 }
 0x654   : > { %v2845_v42 = vpop.f32.mrb[0].mxu1 }
 0x655   : > { %v2515_v40 = vadd.f32 %v2845_v42, %v2681_v16  ;;  %v2509_v44 = vpop.f32.mrb[1].mxu1 }
 0x656   : > { %v2510_v45 = vadd.f32 %v2681_v16, %v2509_v44 }
 0x657   : > { %2519 = vst [vmem:[%s4526_s11 + $0x8] sm:$0xff] %v2515_v40 }
 0x658   : > { %2518 = vst [vmem:[%s4526_s11] sm:$0xff] %v2510_v45 }
 0x659 PF: > { %s21_s19 = sadd.s32 1, %s3530_s19   ;;  %s4531_s17 = smov %s3526_s18 }
 0x65a   : > { %p18_p7 = scmp.ge.s32.totalorder %s21_s19, 4   ;;  %s4532_s18 = smov %s4534_s20 }
 0x65c   :  { %20 = sbr.rel (!%p18_p7) target bundleno = 2 (0x2), region = 114 }

</bundles_post_ra>
